<compile_context>
chip_gen: v7x
topology: tpu7x:2x2x1
jax: 0.10.0
libtpu: 0.0.40
codegen_flags: <defaults>
</compile_context>

<pallas_src>
import functools

import jax
import jax.numpy as jnp
from jax import lax
from jax.experimental import pallas as pl
from jax.experimental.pallas import tpu as pltpu

DROPOUT_P = 0.2
N_EMBED = 384                      # matches the PyTorch module
HIDDEN = 4 * N_EMBED

# Drop an element iff random_u32 < DROPOUT_P * 2^32  (keep probability = 1 - p).
_DROP_THRESHOLD_U32 = int(DROPOUT_P * (1 << 32))
_KEEP_SCALE = 1.0 / (1.0 - DROPOUT_P)


def _round_up(x, m):
    return ((x + m - 1) // m) * m


def _keep_mask_hash(gidx_u32, seed_u32):
    """Stateless fallback keep-mask (interpret/CPU): 32-bit mix of (index, seed)."""
    h = gidx_u32 * jnp.uint32(0x9E3779B1) + seed_u32 * jnp.uint32(0x85EBCA77)
    h = h ^ (h >> 16)
    h = h * jnp.uint32(0x7FEB352D)
    h = h ^ (h >> 15)
    h = h * jnp.uint32(0x846CA68B)
    h = h ^ (h >> 16)
    return h >= jnp.uint32(_DROP_THRESHOLD_U32)


def _ffn_kernel(seed_ref,                                    # scalar-prefetch (SMEM)
                x_ref, w1_ref, b1_ref, w2_ref, b2_ref,       # x tile + VMEM residents
                o_ref,                                       # output tile
                *, apply_dropout, use_hw_rng):
    # Matmuls: bf16 operands, f32 accumulation (MXU fast path).
    x = x_ref[...]                                           # (tm, D) bf16
    h = jnp.dot(x, w1_ref[...], preferred_element_type=jnp.float32) + b1_ref[...]
    h = jnp.maximum(h, 0.0)                                  # ReLU in f32 (VPU)
    y = jnp.dot(h.astype(jnp.bfloat16), w2_ref[...],
                preferred_element_type=jnp.float32) + b2_ref[...]

    if apply_dropout:
        if use_hw_rng:
            # Hardware PRNG: one random-bits op + one u32 compare per vreg.
            pltpu.prng_seed(seed_ref[0], pl.program_id(0))
            bits = pltpu.prng_random_bits(o_ref.shape)
            if bits.dtype != jnp.uint32:
                bits = pltpu.bitcast(bits, jnp.uint32)
            keep = bits >= jnp.uint32(_DROP_THRESHOLD_U32)
        else:
            # Fallback (interpret / non-TPU backends): counter-based hash RNG.
            tm, d = o_ref.shape
            rows = lax.broadcasted_iota(jnp.int32, (tm, d), 0).astype(jnp.uint32)
            cols = lax.broadcasted_iota(jnp.int32, (tm, d), 1).astype(jnp.uint32)
            pid = pl.program_id(0).astype(jnp.uint32)
            gidx = (pid * jnp.uint32(tm) + rows) * jnp.uint32(d) + cols
            keep = _keep_mask_hash(gidx, seed_ref[0].astype(jnp.uint32))
        y = jnp.where(keep, y * jnp.float32(_KEEP_SCALE), 0.0)

    o_ref[...] = y.astype(o_ref.dtype)


@functools.partial(jax.jit, static_argnames=("tm", "training"))
def feed_forward(x, w1, b1, w2, b2, seed, *, tm=1024, training=True):
    """x: (B, T, D) -> (B, T, D) float32.  Linear(D,4D) -> ReLU -> Linear(4D,D) -> Dropout."""
    B, T, D = x.shape
    H = w1.shape[1]
    M = B * T

    # bf16 activation input (halves x HBM traffic); weights expected bf16 already.
    x2 = x.reshape(M, D).astype(jnp.bfloat16)
    w1b = w1 if w1.dtype == jnp.bfloat16 else w1.astype(jnp.bfloat16)
    w2b = w2 if w2.dtype == jnp.bfloat16 else w2.astype(jnp.bfloat16)
    b1_2 = b1.reshape(1, H).astype(jnp.float32)
    b2_2 = b2.reshape(1, D).astype(jnp.float32)
    seed_arr = jnp.asarray([seed], dtype=jnp.int32)

    # Clamp the row tile so tiny batches are not padded/computed as huge tiles.
    # (16 = bf16 sublane packing; keeps block divisibility valid.)
    tm_eff = _round_up(max(16, min(tm, _round_up(M, 16))), 16)
    grid_m = pl.cdiv(M, tm_eff)
    m_pad = grid_m * tm_eff
    if m_pad != M:
        # TODO(synk): for large ragged M, rely on Pallas masked edge blocks instead
        # of this pad copy (pad is negligible at small M, which is the common case).
        x2 = jnp.pad(x2, ((0, m_pad - M), (0, 0)))

    use_hw_rng = jax.default_backend() == "tpu"

    cost = pl.CostEstimate(
        flops=4 * m_pad * D * H,                       # two 2*M*K*N matmuls
        transcendentals=0,
        bytes_accessed=(m_pad * D * 2                  # x in (bf16)
                        + m_pad * D * 4                # out (f32)
                        + 2 * D * H * 2                # bf16 weights (one pass)
                        + (H + D) * 4),                # biases
    )

    grid_spec = pltpu.PrefetchScalarGridSpec(
        num_scalar_prefetch=1,
        grid=(grid_m,),
        in_specs=[
            pl.BlockSpec((tm_eff, D), lambda i, seed: (i, 0)),      # x row tile
            pl.BlockSpec(memory_space=pltpu.MemorySpace.VMEM),      # W1 resident
            pl.BlockSpec(memory_space=pltpu.MemorySpace.VMEM),      # b1 resident
            pl.BlockSpec(memory_space=pltpu.MemorySpace.VMEM),      # W2 resident
            pl.BlockSpec(memory_space=pltpu.MemorySpace.VMEM),      # b2 resident
        ],
        out_specs=pl.BlockSpec((tm_eff, D), lambda i, seed: (i, 0)),
    )

    out2 = pl.pallas_call(
        functools.partial(_ffn_kernel, apply_dropout=training, use_hw_rng=use_hw_rng),
        out_shape=jax.ShapeDtypeStruct((m_pad, D), jnp.float32),
        grid_spec=grid_spec,
        compiler_params=pltpu.CompilerParams(
            dimension_semantics=("parallel",),
            vmem_limit_bytes=48 * 1024 * 1024),
        cost_estimate=cost,
    )(seed_arr, x2, w1b, b1_2, w2b, b2_2)

    return out2[:M].reshape(B, T, D)


def init_params(key, n_embed):
    """Deterministic init matching nn.Linear's U(-1/sqrt(fan_in), 1/sqrt(fan_in))."""
    h = 4 * n_embed
    k1, k2, k3, k4 = jax.random.split(key, 4)
    bound1 = 1.0 / jnp.sqrt(n_embed)
    bound2 = 1.0 / jnp.sqrt(h)
    # stored as (in_features, out_features) so the kernel computes y = x @ W + b
    w1 = jax.random.uniform(k1, (n_embed, h), jnp.float32, -bound1, bound1)
    b1 = jax.random.uniform(k2, (h,),         jnp.float32, -bound1, bound1)
    w2 = jax.random.uniform(k3, (h, n_embed), jnp.float32, -bound2, bound2)
    b2 = jax.random.uniform(k4, (n_embed,),   jnp.float32, -bound2, bound2)
    return w1, b1, w2, b2


if __name__ == "__main__":
    key = jax.random.PRNGKey(0)
    kx, kp = jax.random.split(key)

    B, T = 2, 8
    x = jax.random.normal(kx, (B, T, N_EMBED), jnp.float32)
    w1, b1, w2, b2 = init_params(kp, N_EMBED)
    # Store weights as bf16 once, outside the per-call wrapper (no per-call recast).
    w1 = w1.astype(jnp.bfloat16)
    w2 = w2.astype(jnp.bfloat16)

    # Plain-JAX reference with the same math (bf16 matmul operands, f32 accumulate).
    M, D, H = B * T, N_EMBED, HIDDEN
    x2 = x.reshape(M, D).astype(jnp.bfloat16)
    h_ref = jnp.maximum(
        jnp.dot(x2, w1, preferred_element_type=jnp.float32) + b1.astype(jnp.float32), 0.0)
    y_ref = (jnp.dot(h_ref.astype(jnp.bfloat16), w2, preferred_element_type=jnp.float32)
             + b2.astype(jnp.float32)).reshape(B, T, D)

    # 1) Eval mode (dropout off): full-tensor comparison.
    out_eval = feed_forward(x, w1, b1, w2, b2, seed=0, training=False)
    jax.block_until_ready(out_eval)
    assert jnp.allclose(out_eval, y_ref, rtol=2e-2, atol=2e-2), (
        "eval max abs err = %f" % float(jnp.max(jnp.abs(out_eval - y_ref))))

    # 2) Training mode: kept elements must equal y_ref / (1 - p); drop rate ~ p.
    out_train = feed_forward(x, w1, b1, w2, b2, seed=123, training=True)
    jax.block_until_ready(out_train)
    scaled = y_ref * _KEEP_SCALE
    kept = out_train != 0.0
    kept_err = jnp.where(kept, jnp.abs(out_train - scaled), 0.0)
    assert float(jnp.max(kept_err)) < 2e-2 * (1.0 + float(jnp.max(jnp.abs(scaled)))), (
        "train kept-element max abs err = %f" % float(jnp.max(kept_err)))
    drop_frac = 1.0 - float(jnp.mean(kept.astype(jnp.float32)))
    assert 0.05 < drop_frac < 0.40, drop_frac

    print("KERNEL_OK")
</pallas_src>

<mosaic_0001>
module attributes {stable_mosaic.version = 11 : i64} {
  func.func @_ffn_kernel(%arg0: i32, %arg1: memref<1xi32, #tpu.memory_space<smem>>, %arg2: memref<16x384xbf16, #tpu.memory_space<vmem>>, %arg3: memref<384x1536xbf16, #tpu.memory_space<vmem>>, %arg4: memref<1x1536xf32, #tpu.memory_space<vmem>>, %arg5: memref<1536x384xbf16, #tpu.memory_space<vmem>>, %arg6: memref<1x384xf32, #tpu.memory_space<vmem>>, %arg7: memref<16x384xf32, #tpu.memory_space<vmem>>) attributes {dimension_semantics = [#tpu.dimension_semantics<parallel>], iteration_bounds = array<i64: 1>, scalar_prefetch = 1 : i64, scratch_operands = 0 : i64, tpu.core_type = #tpu.core_type<tc>, window_params = [{transform_indices = @transform_0, window_bounds = array<i64: 16, 384>}, {pipeline_mode = #tpu.pipeline_mode<synchronous>, transform_indices = @transform_1, window_bounds = array<i64: 384, 1536>}, {pipeline_mode = #tpu.pipeline_mode<synchronous>, transform_indices = @transform_2, window_bounds = array<i64: 1, 1536>}, {pipeline_mode = #tpu.pipeline_mode<synchronous>, transform_indices = @transform_3, window_bounds = array<i64: 1536, 384>}, {pipeline_mode = #tpu.pipeline_mode<synchronous>, transform_indices = @transform_4, window_bounds = array<i64: 1, 384>}, {transform_indices = @transform_5, window_bounds = array<i64: 16, 384>}]} {
    %c0 = arith.constant 0 : index
    %c0_0 = arith.constant 0 : index
    %0 = vector.load %arg2[%c0, %c0_0] : memref<16x384xbf16, #tpu.memory_space<vmem>>, vector<16x384xbf16>
    %c0_1 = arith.constant 0 : index
    %c0_2 = arith.constant 0 : index
    %1 = vector.load %arg3[%c0_1, %c0_2] : memref<384x1536xbf16, #tpu.memory_space<vmem>>, vector<384x1536xbf16>
    %cst = arith.constant dense<0.000000e+00> : vector<16x1536xf32>
    %2 = tpu.matmul %0, %1, %cst {dimension_numbers = #tpu.dot_dimension_numbers<[1], [0], [0], [1], [0, 0, 1, 1], [], []>} : vector<16x384xbf16>, vector<384x1536xbf16>, vector<16x1536xf32> -> vector<16x1536xf32>
    %c0_3 = arith.constant 0 : index
    %c0_4 = arith.constant 0 : index
    %3 = vector.load %arg4[%c0_3, %c0_4] : memref<1x1536xf32, #tpu.memory_space<vmem>>, vector<1x1536xf32>
    %4 = vector.broadcast %3 : vector<1x1536xf32> to vector<16x1536xf32>
    %5 = arith.addf %2, %4 : vector<16x1536xf32>
    %cst_5 = arith.constant 0.000000e+00 : f32
    %6 = vector.broadcast %cst_5 : f32 to vector<16x1536xf32>
    %7 = arith.maximumf %5, %6 : vector<16x1536xf32>
    %8 = arith.truncf %7 : vector<16x1536xf32> to vector<16x1536xbf16>
    %c0_6 = arith.constant 0 : index
    %c0_7 = arith.constant 0 : index
    %9 = vector.load %arg5[%c0_6, %c0_7] : memref<1536x384xbf16, #tpu.memory_space<vmem>>, vector<1536x384xbf16>
    %cst_8 = arith.constant dense<0.000000e+00> : vector<16x384xf32>
    %10 = tpu.matmul %8, %9, %cst_8 {dimension_numbers = #tpu.dot_dimension_numbers<[1], [0], [0], [1], [0, 0, 1, 1], [], []>} : vector<16x1536xbf16>, vector<1536x384xbf16>, vector<16x384xf32> -> vector<16x384xf32>
    %c0_9 = arith.constant 0 : index
    %c0_10 = arith.constant 0 : index
    %11 = vector.load %arg6[%c0_9, %c0_10] : memref<1x384xf32, #tpu.memory_space<vmem>>, vector<1x384xf32>
    %12 = vector.broadcast %11 : vector<1x384xf32> to vector<16x384xf32>
    %13 = arith.addf %10, %12 : vector<16x384xf32>
    %c0_11 = arith.constant 0 : index
    %c0_12 = arith.constant 0 : index
    %14 = vector.load %arg7[%c0_11, %c0_12] : memref<16x384xf32, #tpu.memory_space<vmem>>, vector<16x384xf32>
    tpu.vector_store %arg7[%c0_11, %c0_12], %13 {strides = array<i32>} : memref<16x384xf32, #tpu.memory_space<vmem>>, vector<16x384xf32>,
    return
  }
  func.func @transform_0(%arg0: i32, %arg1: memref<1xi32, #tpu.memory_space<smem>>) -> (i32, i32) {
    %c0_i32 = arith.constant 0 : i32
    %c0_i32_0 = arith.constant 0 : i32
    return %arg0, %c0_i32 : i32, i32
  }
  func.func @transform_1(%arg0: i32, %arg1: memref<1xi32, #tpu.memory_space<smem>>) -> (i32, i32) {
    %c0_i32 = arith.constant 0 : i32
    %c0_i32_0 = arith.constant 0 : i32
    %c0_i32_1 = arith.constant 0 : i32
    return %c0_i32, %c0_i32_0 : i32, i32
  }
  func.func @transform_2(%arg0: i32, %arg1: memref<1xi32, #tpu.memory_space<smem>>) -> (i32, i32) {
    %c0_i32 = arith.constant 0 : i32
    %c0_i32_0 = arith.constant 0 : i32
    %c0_i32_1 = arith.constant 0 : i32
    return %c0_i32, %c0_i32_0 : i32, i32
  }
  func.func @transform_3(%arg0: i32, %arg1: memref<1xi32, #tpu.memory_space<smem>>) -> (i32, i32) {
    %c0_i32 = arith.constant 0 : i32
    %c0_i32_0 = arith.constant 0 : i32
    %c0_i32_1 = arith.constant 0 : i32
    return %c0_i32, %c0_i32_0 : i32, i32
  }
  func.func @transform_4(%arg0: i32, %arg1: memref<1xi32, #tpu.memory_space<smem>>) -> (i32, i32) {
    %c0_i32 = arith.constant 0 : i32
    %c0_i32_0 = arith.constant 0 : i32
    %c0_i32_1 = arith.constant 0 : i32
    return %c0_i32, %c0_i32_0 : i32, i32
  }
  func.func @transform_5(%arg0: i32, %arg1: memref<1xi32, #tpu.memory_space<smem>>) -> (i32, i32) {
    %c0_i32 = arith.constant 0 : i32
    %c0_i32_0 = arith.constant 0 : i32
    return %arg0, %c0_i32 : i32, i32
  }
}

</mosaic_0001>

<bundles_post_ra>
// kernel: feed_forward.1
= control target key start
LH: loop header
LB: loop body
LE: loop exit
PB: predicated region body
PF: predicated region fallthrough
CT: control target
= control target key end

     0   :  { %12 = vsyncpa [#allocation5], 0  ;;  %s6796_s0 = inlined_call_operand.<no memory space> [shape: s32[1], index: 0, kind: input, shape index: {}]   ;;  %s6797_s1 = inlined_call_operand.vmem [shape: bf16[16,384], index: 1, kind: input, shape index: {}]   ;;  %s6798_s2 = inlined_call_operand.hbm [shape: bf16[384,1536], index: 2, kind: input, shape index: {}]   ;;  %s6799_s3 = inlined_call_operand.vmem [shape: f32[1,1536], index: 3, kind: input, shape index: {}]   ;;  %s6800_s4 = inlined_call_operand.hbm [shape: bf16[1536,384], index: 4, kind: input, shape index: {}]   ;;  %s6801_s5 = inlined_call_operand.vmem [shape: f32[1,384], index: 5, kind: input, shape index: {}]   ;;  %s6802_s6 = inlined_call_operand.hbm [shape: f32[16,384], index: 6, kind: output, shape index: {}]  }
   0x1   :  { %13 = vsyncpa [#allocation8], 0 }
   0x2   :  { %14 = vsyncpa [#allocation6], 0  ;;  %s6570_s0 = smov [#allocation4]   ;;  %s6498_s24 = scalar_lea.hbm %s6798_s2, 36864 }
   0x3   :  { %s22_s21 = sshll.u32 %s6570_s0, 4  ;;  %p6499_p0 = scmp.ne.s32.totalorder %s6798_s2, %s6498_s24  ;;  %s23_s21 = int_to_ptr.vmem [resolvable:$true] %s22_s21 }
   0x4   :  { %p6502_p1 = scmp.lt.u32.totalorder %s6498_s24, %s6798_s2 }
   0x6   :  { %p6504_p2 = pnand %p6502_p1, %p6499_p0 }
   0x8   :  { %6507 = shalt.err (!%p6504_p2)
}
   0x9   :  { %s6508_s29 = scalar_lea.vmem %s23_s21, 36864  ;;  %p6513_p4 = scmp.lt.s32.totalorder %s23_s21, %s23_s21 }
   0xa   :  { %p6509_p3 = scmp.ne.s32.totalorder %s23_s21, %s6508_s29  ;;  %p6514_p5 = scmp.lt.s32.totalorder %s6508_s29, %s6508_s29 }
   0xc   :  { %p6515_p6 = por %p6514_p5, %p6513_p4 }
   0xe   :  { %p6516_p7 = pnand %p6515_p6, %p6509_p3 }
  0x10   :  { %6519 = shalt.err (!%p6516_p7)
}
  0x11   :  { %s6571_s30 = smov 768   ;;  %s6572_s7 = smov 48  }
  0x12   :  { %28 = dma.hbm_to_vmem [thread:$0]  %s6798_s2, 36864, %s23_s21, [#allocation5], %s6571_s30, %s6571_s30, %s6572_s7  }
  0x13   :  { %s6573_s10 = smov [#allocation7]   ;;  %s6520_s14 = scalar_lea.hbm %s6800_s4, 36864 }
  0x14   :  { %s36_s11 = sshll.u32 %s6573_s10, 4  ;;  %p6521_p8 = scmp.ne.s32.totalorder %s6800_s4, %s6520_s14  ;;  %s37_s11 = int_to_ptr.vmem [resolvable:$true] %s36_s11 }
  0x15   :  { %p6524_p9 = scmp.lt.u32.totalorder %s6520_s14, %s6800_s4 }
  0x17   :  { %p6526_p10 = pnand %p6524_p9, %p6521_p8 }
  0x19   :  { %6529 = shalt.err (!%p6526_p10)
}
  0x1a   :  { %s6530_s19 = scalar_lea.vmem %s37_s11, 36864  ;;  %p6535_p12 = scmp.lt.s32.totalorder %s37_s11, %s37_s11 }
  0x1b   :  { %p6531_p11 = scmp.ne.s32.totalorder %s37_s11, %s6530_s19  ;;  %p6536_p13 = scmp.lt.s32.totalorder %s6530_s19, %s6530_s19 }
  0x1d   :  { %p6537_p0 = por %p6536_p13, %p6535_p12 }
  0x1f   :  { %p6538_p1 = pnand %p6537_p0, %p6531_p11 }
  0x21   :  { %6541 = shalt.err (!%p6538_p1)
}
  0x22   :  { %s6574_s2 = smov 192   ;;  %s6575_s20 = smov 12  }
  0x23   :  { %42 = dma.hbm_to_vmem [thread:$0]  %s6800_s4, 36864, %s37_s11, [#allocation8], %s6574_s2, %s6574_s2, %s6575_s20  }
  0x24   :  { %6564 = dma.done.wait [#allocation5], 36864  }
  0x25   :  { %6565 = vsyncadd [#allocation5], 4294930432 }
  0x26   :  { %6566 = dma.done.wait [#allocation8], 36864  }
  0x27   :  { %6567 = vsyncadd [#allocation8], 4294930432  ;;  %v5674_v0 = vld [vmem:[#allocation4 + $0x4] ss:$48 sps:$4 sm:$0xff]   ;;  %v5676_v1 = vld [vmem:[#allocation4] ss:$48 sps:$4 sm:$0xff]  }
  0x28   :  { %1864 = vmatprep.subr.bf16.mxu1 %v5674_v0  ;;  %v5677_v2 = vld [vmem:[#allocation4 + $0x64] ss:$48 sps:$4 sm:$0xff]   ;;  %v5679_v3 = vld [vmem:[#allocation4 + $0x60] ss:$48 sps:$4 sm:$0xff]   ;;  %v6576_v63 = vmov 0  }
  0x29   :  { %1865 = vmatpush1.bf16.msra.mxu1 %v5676_v1  ;;  %v5680_v4 = vld [vmem:[#allocation4 + $0xc4] ss:$48 sps:$4 sm:$0xff]   ;;  %v5682_v5 = vld [vmem:[#allocation4 + $0xc0] ss:$48 sps:$4 sm:$0xff]  }
  0x2a   :  { %1866 = vmatprep.subr.bf16.mxu1 %v5677_v2  ;;  %v5683_v6 = vld [vmem:[#allocation4 + $0x124] ss:$48 sps:$4 sm:$0xff]   ;;  %v5685_v7 = vld [vmem:[#allocation4 + $0x120] ss:$48 sps:$4 sm:$0xff]  }
  0x2b   :  { %v5686_v8 = vld [vmem:[#allocation4 + $0x184] ss:$48 sps:$4 sm:$0xff]   ;;  %v5688_v9 = vld [vmem:[#allocation4 + $0x180] ss:$48 sps:$4 sm:$0xff]  }
  0x2c   :  { %v5689_v10 = vld [vmem:[#allocation4 + $0x1e4] ss:$48 sps:$4 sm:$0xff]   ;;  %v5691_v11 = vld [vmem:[#allocation4 + $0x1e0] ss:$48 sps:$4 sm:$0xff]  }
  0x2d   :  { %1867 = vmatpush1.bf16.msra.mxu1 %v5679_v3  ;;  %v5692_v12 = vld [vmem:[#allocation4 + $0x244] ss:$48 sps:$4 sm:$0xff]   ;;  %v5694_v14 = vld [vmem:[#allocation4 + $0x240] ss:$48 sps:$4 sm:$0xff]  }
  0x2e   :  { %1868 = vmatprep.subr.bf16.mxu1 %v5680_v4  ;;  %v5719_v13 = vld [vmem:[#allocation4 + $0x14] ss:$48 sps:$4 sm:$0xff]   ;;  %v5723_v16 = vld [vmem:[#allocation4 + $0x10] ss:$48 sps:$4 sm:$0xff]  }
  0x2f   :  { %v5695_v15 = vld [vmem:[#allocation4 + $0x2a4] ss:$48 sps:$4 sm:$0xff]   ;;  %2036 = vmatprep.subr.bf16.mxu0 %v5719_v13  ;;  %v5697_v19 = vld [vmem:[#allocation4 + $0x2a0] ss:$48 sps:$4 sm:$0xff]  }
  0x30   :  { %v5725_v17 = vld [vmem:[#allocation4 + $0x74] ss:$48 sps:$4 sm:$0xff]   ;;  %2037 = vmatpush1.bf16.msra.mxu0 %v5723_v16  ;;  %v5732_v20 = vld [vmem:[#allocation4 + $0x70] ss:$48 sps:$4 sm:$0xff]  }
  0x31   :  { %1869 = vmatpush1.bf16.msra.mxu1 %v5682_v5  ;;  %v6642_v18 = vld [vmem:[%s6797_s1 + $0x4] ss:$12 sps:$4 sm:$0xff]   ;;  %2038 = vmatprep.subr.bf16.mxu0 %v5725_v17  ;;  %v6649_v57 = vld [vmem:[%s6797_s1] ss:$12 sps:$4 sm:$0xff]  }
  0x32   :  { %1870 = vmatprep.subr.bf16.mxu1 %v5683_v6  ;;  %1896 = vmatprep.mubr.bf16.mxu1 %v6642_v18  ;;  %v5734_v21 = vld [vmem:[#allocation4 + $0xd4] ss:$48 sps:$4 sm:$0xff]   ;;  %v5739_v23 = vld [vmem:[#allocation4 + $0xd0] ss:$48 sps:$4 sm:$0xff]  }
  0x33   :  { %2068 = vmatprep.mubr.bf16.mxu0 %v6642_v18  ;;  %v5698_v22 = vld [vmem:[#allocation4 + $0x304] ss:$48 sps:$4 sm:$0xff]   ;;  %v5700_v25 = vld [vmem:[#allocation4 + $0x300] ss:$48 sps:$4 sm:$0xff]  }
  0x34   :  { %2039 = vmatpush1.bf16.msra.mxu0 %v5732_v20  ;;  %v5740_v24 = vld [vmem:[#allocation4 + $0x134] ss:$48 sps:$4 sm:$0xff]   ;;  %v5745_v27 = vld [vmem:[#allocation4 + $0x130] ss:$48 sps:$4 sm:$0xff]  }
  0x35   :  { %1871 = vmatpush1.bf16.msra.mxu1 %v5685_v7  ;;  %2040 = vmatprep.subr.bf16.mxu0 %v5734_v21  ;;  %v5701_v26 = vld [vmem:[#allocation4 + $0x364] ss:$48 sps:$4 sm:$0xff]   ;;  %v5703_v29 = vld [vmem:[#allocation4 + $0x360] ss:$48 sps:$4 sm:$0xff]  }
  0x36   :  { %1872 = vmatprep.subr.bf16.mxu1 %v5686_v8  ;;  %v5746_v28 = vld [vmem:[#allocation4 + $0x194] ss:$48 sps:$4 sm:$0xff]   ;;  %v5751_v31 = vld [vmem:[#allocation4 + $0x190] ss:$48 sps:$4 sm:$0xff]  }
  0x37   :  { %v5704_v30 = vld [vmem:[#allocation4 + $0x3c4] ss:$48 sps:$4 sm:$0xff]   ;;  %v5706_v33 = vld [vmem:[#allocation4 + $0x3c0] ss:$48 sps:$4 sm:$0xff]  }
  0x38   :  { %2041 = vmatpush1.bf16.msra.mxu0 %v5739_v23  ;;  %v5752_v32 = vld [vmem:[#allocation4 + $0x1f4] ss:$48 sps:$4 sm:$0xff]   ;;  %v5757_v35 = vld [vmem:[#allocation4 + $0x1f0] ss:$48 sps:$4 sm:$0xff]  }
  0x39   :  { %1873 = vmatpush1.bf16.msra.mxu1 %v5688_v9  ;;  %2042 = vmatprep.subr.bf16.mxu0 %v5740_v24  ;;  %v5707_v34 = vld [vmem:[#allocation4 + $0x424] ss:$48 sps:$4 sm:$0xff]   ;;  %v5709_v37 = vld [vmem:[#allocation4 + $0x420] ss:$48 sps:$4 sm:$0xff]  }
  0x3a   :  { %1874 = vmatprep.subr.bf16.mxu1 %v5689_v10  ;;  %v5758_v36 = vld [vmem:[#allocation4 + $0x254] ss:$48 sps:$4 sm:$0xff]   ;;  %v5763_v39 = vld [vmem:[#allocation4 + $0x250] ss:$48 sps:$4 sm:$0xff]  }
  0x3b   :  { %v5710_v38 = vld [vmem:[#allocation4 + $0x484] ss:$48 sps:$4 sm:$0xff]   ;;  %v5712_v41 = vld [vmem:[#allocation4 + $0x480] ss:$48 sps:$4 sm:$0xff]  }
  0x3c   :  { %2043 = vmatpush1.bf16.msra.mxu0 %v5745_v27  ;;  %v5764_v40 = vld [vmem:[#allocation4 + $0x2b4] ss:$48 sps:$4 sm:$0xff]   ;;  %v5769_v43 = vld [vmem:[#allocation4 + $0x2b0] ss:$48 sps:$4 sm:$0xff]  }
  0x3d   :  { %1875 = vmatpush1.bf16.msra.mxu1 %v5691_v11  ;;  %2044 = vmatprep.subr.bf16.mxu0 %v5746_v28  ;;  %v5713_v42 = vld [vmem:[#allocation4 + $0x4e4] ss:$48 sps:$4 sm:$0xff]   ;;  %v5715_v45 = vld [vmem:[#allocation4 + $0x4e0] ss:$48 sps:$4 sm:$0xff]  }
  0x3e   :  { %1876 = vmatprep.subr.bf16.mxu1 %v5692_v12  ;;  %v5770_v44 = vld [vmem:[#allocation4 + $0x314] ss:$48 sps:$4 sm:$0xff]   ;;  %v5775_v47 = vld [vmem:[#allocation4 + $0x310] ss:$48 sps:$4 sm:$0xff]  }
  0x3f   :  { %v5716_v46 = vld [vmem:[#allocation4 + $0x544] ss:$48 sps:$4 sm:$0xff]   ;;  %v5718_v49 = vld [vmem:[#allocation4 + $0x540] ss:$48 sps:$4 sm:$0xff]  }
  0x40   :  { %2045 = vmatpush1.bf16.msra.mxu0 %v5751_v31  ;;  %v5776_v48 = vld [vmem:[#allocation4 + $0x374] ss:$48 sps:$4 sm:$0xff]   ;;  %v5782_v51 = vld [vmem:[#allocation4 + $0x370] ss:$48 sps:$4 sm:$0xff]  }
  0x41   :  { %1877 = vmatpush1.bf16.msra.mxu1 %v5694_v14  ;;  %2046 = vmatprep.subr.bf16.mxu0 %v5752_v32  ;;  %v5721_v50 = vld [vmem:[#allocation4 + $0x5a4] ss:$48 sps:$4 sm:$0xff]   ;;  %v5724_v53 = vld [vmem:[#allocation4 + $0x5a0] ss:$48 sps:$4 sm:$0xff]  }
  0x42   :  { %1878 = vmatprep.subr.bf16.mxu1 %v5695_v15  ;;  %v5783_v52 = vld [vmem:[#allocation4 + $0x3d4] ss:$48 sps:$4 sm:$0xff]   ;;  %v5788_v55 = vld [vmem:[#allocation4 + $0x3d0] ss:$48 sps:$4 sm:$0xff]  }
  0x43   :  { %v5731_v54 = vld [vmem:[#allocation4 + $0x604] ss:$48 sps:$4 sm:$0xff]   ;;  %v5729_v58 = vld [vmem:[#allocation4 + $0x600] ss:$48 sps:$4 sm:$0xff]  }
  0x44   :  { %2047 = vmatpush1.bf16.msra.mxu0 %v5757_v35  ;;  %v5789_v56 = vld [vmem:[#allocation4 + $0x434] ss:$48 sps:$4 sm:$0xff]   ;;  %v5794_v60 = vld [vmem:[#allocation4 + $0x430] ss:$48 sps:$4 sm:$0xff]  }
  0x45   :  { %1879 = vmatpush1.bf16.msra.mxu1 %v5697_v19  ;;  %2048 = vmatprep.subr.bf16.mxu0 %v5758_v36  ;;  %v5738_v59 = vld [vmem:[#allocation4 + $0x664] ss:$48 sps:$4 sm:$0xff]   ;;  %v5736_v62 = vld [vmem:[#allocation4 + $0x660] ss:$48 sps:$4 sm:$0xff]  }
  0x46   :  { %1880 = vmatprep.subr.bf16.mxu1 %v5698_v22  ;;  %v5795_v61 = vld [vmem:[#allocation4 + $0x494] ss:$48 sps:$4 sm:$0xff]   ;;  %v5800_v1 = vld [vmem:[#allocation4 + $0x490] ss:$48 sps:$4 sm:$0xff]  }
  0x47   :  { %v5744_v0 = vld [vmem:[#allocation4 + $0x6c4] ss:$48 sps:$4 sm:$0xff]   ;;  %v5742_v3 = vld [vmem:[#allocation4 + $0x6c0] ss:$48 sps:$4 sm:$0xff]  }
  0x48   :  { %2049 = vmatpush1.bf16.msra.mxu0 %v5763_v39  ;;  %v5801_v2 = vld [vmem:[#allocation4 + $0x4f4] ss:$48 sps:$4 sm:$0xff]   ;;  %v5806_v5 = vld [vmem:[#allocation4 + $0x4f0] ss:$48 sps:$4 sm:$0xff]  }
  0x49   :  { %1881 = vmatpush1.bf16.msra.mxu1 %v5700_v25  ;;  %2050 = vmatprep.subr.bf16.mxu0 %v5764_v40  ;;  %v5750_v4 = vld [vmem:[#allocation4 + $0x724] ss:$48 sps:$4 sm:$0xff]   ;;  %v5748_v7 = vld [vmem:[#allocation4 + $0x720] ss:$48 sps:$4 sm:$0xff]   ;;  %v5781_v25 = vld [vmem:[#allocation4 + $0xc] ss:$48 sps:$4 sm:$0xff]  }
  0x4a   :  { %1882 = vmatprep.subr.bf16.mxu1 %v5701_v26  ;;  %v5807_v6 = vld [vmem:[#allocation4 + $0x554] ss:$48 sps:$4 sm:$0xff]   ;;  %v5812_v9 = vld [vmem:[#allocation4 + $0x550] ss:$48 sps:$4 sm:$0xff]  }
  0x4b   :  { %v5756_v8 = vld [vmem:[#allocation4 + $0x784] ss:$48 sps:$4 sm:$0xff]   ;;  %v5754_v11 = vld [vmem:[#allocation4 + $0x780] ss:$48 sps:$4 sm:$0xff]  }
  0x4c   :  { %2051 = vmatpush1.bf16.msra.mxu0 %v5769_v43  ;;  %v5813_v10 = vld [vmem:[#allocation4 + $0x5b4] ss:$48 sps:$4 sm:$0xff]   ;;  %v5818_v13 = vld [vmem:[#allocation4 + $0x5b0] ss:$48 sps:$4 sm:$0xff]  }
  0x4d   :  { %1883 = vmatpush1.bf16.msra.mxu1 %v5703_v29  ;;  %2052 = vmatprep.subr.bf16.mxu0 %v5770_v44  ;;  %v5762_v12 = vld [vmem:[#allocation4 + $0x7e4] ss:$48 sps:$4 sm:$0xff]   ;;  %v5760_v15 = vld [vmem:[#allocation4 + $0x7e0] ss:$48 sps:$4 sm:$0xff]   ;;  %v5779_v29 = vld [vmem:[#allocation4 + $0x8] ss:$48 sps:$4 sm:$0xff]  }
  0x4e   :  { %1884 = vmatprep.subr.bf16.mxu1 %v5704_v30  ;;  %v5821_v14 = vld [vmem:[#allocation4 + $0x614] ss:$48 sps:$4 sm:$0xff]   ;;  %v5819_v17 = vld [vmem:[#allocation4 + $0x610] ss:$48 sps:$4 sm:$0xff]   ;;  %v5787_v30 = vld [vmem:[#allocation4 + $0x6c] ss:$48 sps:$4 sm:$0xff]  }
  0x4f   :  { %v5768_v16 = vld [vmem:[#allocation4 + $0x844] ss:$48 sps:$4 sm:$0xff]   ;;  %v5766_v20 = vld [vmem:[#allocation4 + $0x840] ss:$48 sps:$4 sm:$0xff]  }
  0x50   :  { %2053 = vmatpush1.bf16.msra.mxu0 %v5775_v47  ;;  %v5827_v19 = vld [vmem:[#allocation4 + $0x674] ss:$48 sps:$4 sm:$0xff]   ;;  %v5825_v22 = vld [vmem:[#allocation4 + $0x670] ss:$48 sps:$4 sm:$0xff]  }
  0x51   :  { %1885 = vmatpush1.bf16.msra.mxu1 %v5706_v33  ;;  %2054 = vmatprep.subr.bf16.mxu0 %v5776_v48  ;;  %v5774_v21 = vld [vmem:[#allocation4 + $0x8a4] ss:$48 sps:$4 sm:$0xff]   ;;  %v5772_v24 = vld [vmem:[#allocation4 + $0x8a0] ss:$48 sps:$4 sm:$0xff]   ;;  %v5785_v33 = vld [vmem:[#allocation4 + $0x68] ss:$48 sps:$4 sm:$0xff]  }
  0x52   :  { %1886 = vmatprep.subr.bf16.mxu1 %v5707_v34  ;;  %v5833_v23 = vld [vmem:[#allocation4 + $0x6d4] ss:$48 sps:$4 sm:$0xff]   ;;  %v5831_v26 = vld [vmem:[#allocation4 + $0x6d0] ss:$48 sps:$4 sm:$0xff]   ;;  %v5793_v34 = vld [vmem:[#allocation4 + $0xcc] ss:$48 sps:$4 sm:$0xff]  }
  0x53   :  { %v5839_v27 = vld [vmem:[#allocation4 + $0x734] ss:$48 sps:$4 sm:$0xff]   ;;  %v5837_v31 = vld [vmem:[#allocation4 + $0x730] ss:$48 sps:$4 sm:$0xff]  }
  0x54   :  { %2055 = vmatpush1.bf16.msra.mxu0 %v5782_v51  ;;  %v6658_v28 = vld [vmem:[%s6797_s1 + $0x8] ss:$12 sps:$4 sm:$0xff]   ;;  %v5843_v35 = vld [vmem:[#allocation4 + $0x790] ss:$48 sps:$4 sm:$0xff]  }
  0x55   :  { %1887 = vmatpush1.bf16.msra.mxu1 %v5709_v37  ;;  %2056 = vmatprep.subr.bf16.mxu0 %v5783_v52  ;;  %v5845_v32 = vld [vmem:[#allocation4 + $0x794] ss:$48 sps:$4 sm:$0xff]   ;;  %v5791_v37 = vld [vmem:[#allocation4 + $0xc8] ss:$48 sps:$4 sm:$0xff]   ;;  %v5849_v39 = vld [vmem:[#allocation4 + $0x7f0] ss:$48 sps:$4 sm:$0xff]  }
  0x56   :  { %1888 = vmatprep.subr.bf16.mxu1 %v5710_v38  ;;  %v5851_v36 = vld [vmem:[#allocation4 + $0x7f4] ss:$48 sps:$4 sm:$0xff]   ;;  %v5799_v38 = vld [vmem:[#allocation4 + $0x12c] ss:$48 sps:$4 sm:$0xff]   ;;  %v5855_v43 = vld [vmem:[#allocation4 + $0x850] ss:$48 sps:$4 sm:$0xff]  }
  0x57   :  { %v5857_v40 = vld [vmem:[#allocation4 + $0x854] ss:$48 sps:$4 sm:$0xff]   ;;  %v5861_v47 = vld [vmem:[#allocation4 + $0x8b0] ss:$48 sps:$4 sm:$0xff]  }
  0x58   :  { %2057 = vmatpush1.bf16.msra.mxu0 %v5788_v55  ;;  %v5863_v44 = vld [vmem:[#allocation4 + $0x8b4] ss:$48 sps:$4 sm:$0xff]   ;;  %v5867_v51 = vld [vmem:[#allocation4 + $0x20] ss:$48 sps:$4 sm:$0xff]  }
  0x59   :  { %1889 = vmatpush1.bf16.msra.mxu1 %v5712_v41  ;;  %2058 = vmatprep.subr.bf16.mxu0 %v5789_v56  ;;  %v5797_v41 = vld [vmem:[#allocation4 + $0x128] ss:$48 sps:$4 sm:$0xff]   ;;  %v5869_v48 = vld [vmem:[#allocation4 + $0x24] ss:$48 sps:$4 sm:$0xff]   ;;  %v5873_v55 = vld [vmem:[#allocation4 + $0x80] ss:$48 sps:$4 sm:$0xff]  }
  0x5a   :  { %1890 = vmatprep.subr.bf16.mxu1 %v5713_v42  ;;  %v5805_v42 = vld [vmem:[#allocation4 + $0x18c] ss:$48 sps:$4 sm:$0xff]   ;;  %v5875_v52 = vld [vmem:[#allocation4 + $0x84] ss:$48 sps:$4 sm:$0xff]  }
  0x5b   :  { %v5881_v56 = vld [vmem:[#allocation4 + $0xe4] ss:$48 sps:$4 sm:$0xff]  }
  0x5c   :  { %2059 = vmatpush1.bf16.msra.mxu0 %v5794_v60  ;;  %v5879_v60 = vld [vmem:[#allocation4 + $0xe0] ss:$48 sps:$4 sm:$0xff]  }
  0x5d   :  { %1891 = vmatpush1.bf16.msra.mxu1 %v5715_v45  ;;  %2060 = vmatprep.subr.bf16.mxu0 %v5795_v61  ;;  %v5803_v45 = vld [vmem:[#allocation4 + $0x188] ss:$48 sps:$4 sm:$0xff]   ;;  %v5887_v61 = vld [vmem:[#allocation4 + $0x144] ss:$48 sps:$4 sm:$0xff]  }
  0x5e   :  { %1892 = vmatprep.subr.bf16.mxu1 %v5716_v46  ;;  %v5811_v46 = vld [vmem:[#allocation4 + $0x1ec] ss:$48 sps:$4 sm:$0xff]  }
  0x60   :  { %2061 = vmatpush1.bf16.msra.mxu0 %v5800_v1  ;;  %v5885_v1 = vld [vmem:[#allocation4 + $0x140] ss:$48 sps:$4 sm:$0xff]  }
  0x61   :  { %1893 = vmatpush1.bf16.msra.mxu1 %v5718_v49  ;;  %2062 = vmatprep.subr.bf16.mxu0 %v5801_v2  ;;  %v5809_v49 = vld [vmem:[#allocation4 + $0x1e8] ss:$48 sps:$4 sm:$0xff]   ;;  %v5893_v2 = vld [vmem:[#allocation4 + $0x1a4] ss:$48 sps:$4 sm:$0xff]  }
  0x62   :  { %1894 = vmatprep.subr.bf16.mxu1 %v5721_v50  ;;  %v5817_v50 = vld [vmem:[#allocation4 + $0x24c] ss:$48 sps:$4 sm:$0xff]  }
  0x64   :  { %2063 = vmatpush1.bf16.msra.mxu0 %v5806_v5  ;;  %v5899_v5 = vld [vmem:[#allocation4 + $0x204] ss:$48 sps:$4 sm:$0xff]  }
  0x65   :  { %1895 = vmatpush1.bf16.msra.mxu1 %v5724_v53  ;;  %2064 = vmatprep.subr.bf16.mxu0 %v5807_v6  ;;  %v5815_v53 = vld [vmem:[#allocation4 + $0x248] ss:$48 sps:$4 sm:$0xff]  }
  0x66   :  { %1907 = vmatprep.subr.bf16.mxu1 %v5731_v54  ;;  %v5824_v54 = vld [vmem:[#allocation4 + $0x2ac] ss:$48 sps:$4 sm:$0xff]   ;;  %v5840_v6 = vld [vmem:[#allocation4 + $0x3c8] ss:$48 sps:$4 sm:$0xff]  }
  0x68   :  { %1897 = vmatmul.mubr.bf16.vlgmr.msra.gmra.mrb[0].mxu1 %v6649_v57  ;;  %2065 = vmatpush1.bf16.msra.mxu0 %v5812_v9  ;;  %v5905_v9 = vld [vmem:[#allocation4 + $0x264] ss:$48 sps:$4 sm:$0xff]  }
  0x69   :  { %1908 = vmatpush1.bf16.msra.mxu1 %v5729_v58  ;;  %1939 = vmatprep.mubr.bf16.mxu1 %v6576_v63  ;;  %v5822_v58 = vld [vmem:[#allocation4 + $0x2a8] ss:$48 sps:$4 sm:$0xff]  }
  0x6a   :  { %1909 = vmatprep.subr.bf16.mxu1 %v5738_v59  ;;  %2066 = vmatprep.subr.bf16.mxu0 %v5813_v10  ;;  %v5830_v59 = vld [vmem:[#allocation4 + $0x30c] ss:$48 sps:$4 sm:$0xff]   ;;  %v5846_v10 = vld [vmem:[#allocation4 + $0x428] ss:$48 sps:$4 sm:$0xff]  }
  0x6c   :  { %2067 = vmatpush1.bf16.msra.mxu0 %v5818_v13  ;;  %v5911_v13 = vld [vmem:[#allocation4 + $0x2c4] ss:$48 sps:$4 sm:$0xff]  }
  0x6d   :  { %1910 = vmatpush1.bf16.msra.mxu1 %v5736_v62  ;;  %2079 = vmatprep.subr.bf16.mxu0 %v5821_v14  ;;  %v5828_v62 = vld [vmem:[#allocation4 + $0x308] ss:$48 sps:$4 sm:$0xff]  }
  0x6e   :  { %1911 = vmatprep.subr.bf16.mxu1 %v5744_v0  ;;  %v5836_v0 = vld [vmem:[#allocation4 + $0x36c] ss:$48 sps:$4 sm:$0xff]   ;;  %v5852_v14 = vld [vmem:[#allocation4 + $0x488] ss:$48 sps:$4 sm:$0xff]  }
  0x6f   :  { %2069 = vmatmul.mubr.bf16.vlgmr.msra.gmra.mrb[0].mxu0 %v6649_v57 }
  0x70   :  { %2080 = vmatpush1.bf16.msra.mxu0 %v5819_v17  ;;  %2111 = vmatprep.mubr.bf16.mxu0 %v6576_v63  ;;  %v5917_v17 = vld [vmem:[#allocation4 + $0x324] ss:$48 sps:$4 sm:$0xff]  }
  0x71   :  { %1912 = vmatpush1.bf16.msra.mxu1 %v5742_v3  ;;  %2081 = vmatprep.subr.bf16.mxu0 %v5827_v19  ;;  %v5834_v3 = vld [vmem:[#allocation4 + $0x368] ss:$48 sps:$4 sm:$0xff]  }
  0x72   :  { %1913 = vmatprep.subr.bf16.mxu1 %v5750_v4  ;;  %v5891_v4 = vld [vmem:[#allocation4 + $0x1a0] ss:$48 sps:$4 sm:$0xff]   ;;  %v5858_v19 = vld [vmem:[#allocation4 + $0x4e8] ss:$48 sps:$4 sm:$0xff]  }
  0x74   :  { %2082 = vmatpush1.bf16.msra.mxu0 %v5825_v22  ;;  %v5923_v22 = vld [vmem:[#allocation4 + $0x384] ss:$48 sps:$4 sm:$0xff]  }
  0x75   :  { %1914 = vmatpush1.bf16.msra.mxu1 %v5748_v7  ;;  %2083 = vmatprep.subr.bf16.mxu0 %v5833_v23  ;;  %v5848_v7 = vld [vmem:[#allocation4 + $0x42c] ss:$48 sps:$4 sm:$0xff]   ;;  %v5864_v23 = vld [vmem:[#allocation4 + $0x548] ss:$48 sps:$4 sm:$0xff]  }
  0x76   :  { %1915 = vmatprep.subr.bf16.mxu1 %v5756_v8  ;;  %v5897_v8 = vld [vmem:[#allocation4 + $0x200] ss:$48 sps:$4 sm:$0xff]  }
  0x78   :  { %2084 = vmatpush1.bf16.msra.mxu0 %v5831_v26  ;;  %v5929_v26 = vld [vmem:[#allocation4 + $0x3e4] ss:$48 sps:$4 sm:$0xff]  }
  0x79   :  { %1916 = vmatpush1.bf16.msra.mxu1 %v5754_v11  ;;  %2085 = vmatprep.subr.bf16.mxu0 %v5839_v27  ;;  %v5854_v11 = vld [vmem:[#allocation4 + $0x48c] ss:$48 sps:$4 sm:$0xff]   ;;  %v5870_v27 = vld [vmem:[#allocation4 + $0x5a8] ss:$48 sps:$4 sm:$0xff]  }
  0x7a   :  { %1917 = vmatprep.subr.bf16.mxu1 %v5762_v12  ;;  %v5903_v12 = vld [vmem:[#allocation4 + $0x260] ss:$48 sps:$4 sm:$0xff]  }
  0x7c   :  { %2086 = vmatpush1.bf16.msra.mxu0 %v5837_v31  ;;  %v5935_v31 = vld [vmem:[#allocation4 + $0x444] ss:$48 sps:$4 sm:$0xff]  }
  0x7d   :  { %1918 = vmatpush1.bf16.msra.mxu1 %v5760_v15  ;;  %2087 = vmatprep.subr.bf16.mxu0 %v5845_v32  ;;  %v5860_v15 = vld [vmem:[#allocation4 + $0x4ec] ss:$48 sps:$4 sm:$0xff]   ;;  %v5876_v32 = vld [vmem:[#allocation4 + $0x608] ss:$48 sps:$4 sm:$0xff]  }
  0x7e   :  { %1919 = vmatprep.subr.bf16.mxu1 %v5768_v16  ;;  %v5909_v16 = vld [vmem:[#allocation4 + $0x2c0] ss:$48 sps:$4 sm:$0xff]  }
  0x80   :  { %2088 = vmatpush1.bf16.msra.mxu0 %v5843_v35  ;;  %v5941_v35 = vld [vmem:[#allocation4 + $0x4a4] ss:$48 sps:$4 sm:$0xff]  }
  0x81   :  { %1920 = vmatpush1.bf16.msra.mxu1 %v5766_v20  ;;  %2089 = vmatprep.subr.bf16.mxu0 %v5851_v36  ;;  %v5866_v20 = vld [vmem:[#allocation4 + $0x54c] ss:$48 sps:$4 sm:$0xff]   ;;  %v5882_v36 = vld [vmem:[#allocation4 + $0x668] ss:$48 sps:$4 sm:$0xff]  }
  0x82   :  { %1921 = vmatprep.subr.bf16.mxu1 %v5774_v21  ;;  %v5915_v21 = vld [vmem:[#allocation4 + $0x320] ss:$48 sps:$4 sm:$0xff]  }
  0x84   :  { %2090 = vmatpush1.bf16.msra.mxu0 %v5849_v39  ;;  %v5947_v39 = vld [vmem:[#allocation4 + $0x504] ss:$48 sps:$4 sm:$0xff]  }
  0x85   :  { %1922 = vmatpush1.bf16.msra.mxu1 %v5772_v24  ;;  %2091 = vmatprep.subr.bf16.mxu0 %v5857_v40  ;;  %v5872_v24 = vld [vmem:[#allocation4 + $0x5ac] ss:$48 sps:$4 sm:$0xff]   ;;  %v5888_v40 = vld [vmem:[#allocation4 + $0x6c8] ss:$48 sps:$4 sm:$0xff]  }
  0x86   :  { %1950 = vmatprep.subr.bf16.mxu1 %v5781_v25  ;;  %v5921_v25 = vld [vmem:[#allocation4 + $0x380] ss:$48 sps:$4 sm:$0xff]  }
  0x88   :  { %1940 = vmatmul.mubr.bf16.vlgmr.msra.gmra.mrb[0].mxu1 %v6658_v28  ;;  %2092 = vmatpush1.bf16.msra.mxu0 %v5855_v43  ;;  %v5953_v43 = vld [vmem:[#allocation4 + $0x564] ss:$48 sps:$4 sm:$0xff]  }
  0x89   :  { %1951 = vmatpush1.bf16.msra.mxu1 %v5779_v29  ;;  %1982 = vmatprep.mubr.bf16.mxu1 %v6642_v18  ;;  %v5878_v29 = vld [vmem:[#allocation4 + $0x60c] ss:$48 sps:$4 sm:$0xff]  }
  0x8a   :  { %1952 = vmatprep.subr.bf16.mxu1 %v5787_v30  ;;  %2093 = vmatprep.subr.bf16.mxu0 %v5863_v44  ;;  %v5927_v30 = vld [vmem:[#allocation4 + $0x3e0] ss:$48 sps:$4 sm:$0xff]   ;;  %v5894_v44 = vld [vmem:[#allocation4 + $0x728] ss:$48 sps:$4 sm:$0xff]  }
  0x8c   :  { %2094 = vmatpush1.bf16.msra.mxu0 %v5861_v47  ;;  %v5959_v47 = vld [vmem:[#allocation4 + $0x5c4] ss:$48 sps:$4 sm:$0xff]  }
  0x8d   :  { %1953 = vmatpush1.bf16.msra.mxu1 %v5785_v33  ;;  %2208 = vmatprep.subr.bf16.mxu0 %v5869_v48  ;;  %v5884_v33 = vld [vmem:[#allocation4 + $0x66c] ss:$48 sps:$4 sm:$0xff]   ;;  %v5900_v48 = vld [vmem:[#allocation4 + $0x788] ss:$48 sps:$4 sm:$0xff]  }
  0x8e   :  { %1954 = vmatprep.subr.bf16.mxu1 %v5793_v34  ;;  %v5933_v34 = vld [vmem:[#allocation4 + $0x440] ss:$48 sps:$4 sm:$0xff]  }
  0x8f   :  { %2112 = vmatmul.mubr.bf16.vlgmr.msra.gmra.mrb[0].mxu0 %v6658_v28 }
  0x90   :  { %2209 = vmatpush1.bf16.msra.mxu0 %v5867_v51  ;;  %2240 = vmatprep.mubr.bf16.mxu0 %v6642_v18  ;;  %v5842_v18 = vld [vmem:[#allocation4 + $0x3cc] ss:$48 sps:$4 sm:$0xff]   ;;  %v5965_v51 = vld [vmem:[#allocation4 + $0x624] ss:$48 sps:$4 sm:$0xff]  }
  0x91   :  { %1955 = vmatpush1.bf16.msra.mxu1 %v5791_v37  ;;  %2210 = vmatprep.subr.bf16.mxu0 %v5875_v52  ;;  %v5890_v37 = vld [vmem:[#allocation4 + $0x6cc] ss:$48 sps:$4 sm:$0xff]   ;;  %v5906_v52 = vld [vmem:[#allocation4 + $0x7e8] ss:$48 sps:$4 sm:$0xff]  }
  0x92   :  { %1956 = vmatprep.subr.bf16.mxu1 %v5799_v38  ;;  %v5939_v38 = vld [vmem:[#allocation4 + $0x4a0] ss:$48 sps:$4 sm:$0xff]  }
  0x94   :  { %2211 = vmatpush1.bf16.msra.mxu0 %v5873_v55  ;;  %v5971_v55 = vld [vmem:[#allocation4 + $0x684] ss:$48 sps:$4 sm:$0xff]  }
  0x95   :  { %1957 = vmatpush1.bf16.msra.mxu1 %v5797_v41  ;;  %2212 = vmatprep.subr.bf16.mxu0 %v5881_v56  ;;  %v5896_v41 = vld [vmem:[#allocation4 + $0x72c] ss:$48 sps:$4 sm:$0xff]   ;;  %v5912_v56 = vld [vmem:[#allocation4 + $0x848] ss:$48 sps:$4 sm:$0xff]  }
  0x96   :  { %1958 = vmatprep.subr.bf16.mxu1 %v5805_v42  ;;  %v5945_v42 = vld [vmem:[#allocation4 + $0x500] ss:$48 sps:$4 sm:$0xff]  }
  0x98   :  { %2213 = vmatpush1.bf16.msra.mxu0 %v5879_v60  ;;  %v5977_v60 = vld [vmem:[#allocation4 + $0x6e4] ss:$48 sps:$4 sm:$0xff]  }
  0x99   :  { %1959 = vmatpush1.bf16.msra.mxu1 %v5803_v45  ;;  %2214 = vmatprep.subr.bf16.mxu0 %v5887_v61  ;;  %v5902_v45 = vld [vmem:[#allocation4 + $0x78c] ss:$48 sps:$4 sm:$0xff]   ;;  %v5918_v61 = vld [vmem:[#allocation4 + $0x8a8] ss:$48 sps:$4 sm:$0xff]  }
  0x9a   :  { %1960 = vmatprep.subr.bf16.mxu1 %v5811_v46  ;;  %v5951_v46 = vld [vmem:[#allocation4 + $0x560] ss:$48 sps:$4 sm:$0xff]  }
  0x9c   :  { %2215 = vmatpush1.bf16.msra.mxu0 %v5885_v1  ;;  %v5983_v1 = vld [vmem:[#allocation4 + $0x744] ss:$48 sps:$4 sm:$0xff]  }
  0x9d   :  { %1961 = vmatpush1.bf16.msra.mxu1 %v5809_v49  ;;  %2216 = vmatprep.subr.bf16.mxu0 %v5893_v2  ;;  %v5908_v49 = vld [vmem:[#allocation4 + $0x7ec] ss:$48 sps:$4 sm:$0xff]   ;;  %v5924_v2 = vld [vmem:[#allocation4 + $0x18] ss:$48 sps:$4 sm:$0xff]  }
  0x9e   :  { %1962 = vmatprep.subr.bf16.mxu1 %v5817_v50  ;;  %v5957_v50 = vld [vmem:[#allocation4 + $0x5c0] ss:$48 sps:$4 sm:$0xff]  }
  0xa0   :  { %2217 = vmatpush1.bf16.msra.mxu0 %v5891_v4  ;;  %v5930_v4 = vld [vmem:[#allocation4 + $0x78] ss:$48 sps:$4 sm:$0xff]  }
  0xa1   :  { %1963 = vmatpush1.bf16.msra.mxu1 %v5815_v53  ;;  %2218 = vmatprep.subr.bf16.mxu0 %v5899_v5  ;;  %v5914_v53 = vld [vmem:[#allocation4 + $0x84c] ss:$48 sps:$4 sm:$0xff]  }
  0xa2   :  { %1964 = vmatprep.subr.bf16.mxu1 %v5824_v54  ;;  %v5963_v54 = vld [vmem:[#allocation4 + $0x620] ss:$48 sps:$4 sm:$0xff]   ;;  %v5938_v5 = vld [vmem:[#allocation4 + $0xdc] ss:$48 sps:$4 sm:$0xff]  }
  0xa4   :  { %2219 = vmatpush1.bf16.msra.mxu0 %v5897_v8  ;;  %v5936_v8 = vld [vmem:[#allocation4 + $0xd8] ss:$48 sps:$4 sm:$0xff]  }
  0xa5   :  { %1965 = vmatpush1.bf16.msra.mxu1 %v5822_v58  ;;  %2220 = vmatprep.subr.bf16.mxu0 %v5905_v9  ;;  %v5920_v58 = vld [vmem:[#allocation4 + $0x8ac] ss:$48 sps:$4 sm:$0xff]   ;;  %v5995_v9 = vld [vmem:[#allocation4 + $0x804] ss:$48 sps:$4 sm:$0xff]  }
  0xa6   :  { %1966 = vmatprep.subr.bf16.mxu1 %v5830_v59  ;;  %v5969_v59 = vld [vmem:[#allocation4 + $0x680] ss:$48 sps:$4 sm:$0xff]  }
  0xa8   :  { %2221 = vmatpush1.bf16.msra.mxu0 %v5903_v12  ;;  %v6001_v12 = vld [vmem:[#allocation4 + $0x864] ss:$48 sps:$4 sm:$0xff]  }
  0xa9   :  { %1967 = vmatpush1.bf16.msra.mxu1 %v5828_v62  ;;  %2222 = vmatprep.subr.bf16.mxu0 %v5911_v13  ;;  %v5926_v62 = vld [vmem:[#allocation4 + $0x1c] ss:$48 sps:$4 sm:$0xff]   ;;  %v5942_v13 = vld [vmem:[#allocation4 + $0x138] ss:$48 sps:$4 sm:$0xff]  }
  0xaa   :  { %1968 = vmatprep.subr.bf16.mxu1 %v5836_v0  ;;  %v5975_v0 = vld [vmem:[#allocation4 + $0x6e0] ss:$48 sps:$4 sm:$0xff]  }
  0xac   :  { %2223 = vmatpush1.bf16.msra.mxu0 %v5909_v16  ;;  %v6007_v16 = vld [vmem:[#allocation4 + $0x8c4] ss:$48 sps:$4 sm:$0xff]  }
  0xad   :  { %1969 = vmatpush1.bf16.msra.mxu1 %v5834_v3  ;;  %2224 = vmatprep.subr.bf16.mxu0 %v5917_v17  ;;  %v5932_v3 = vld [vmem:[#allocation4 + $0x7c] ss:$48 sps:$4 sm:$0xff]   ;;  %v5948_v17 = vld [vmem:[#allocation4 + $0x198] ss:$48 sps:$4 sm:$0xff]  }
  0xae   :  { %1970 = vmatprep.subr.bf16.mxu1 %v5842_v18  ;;  %v5989_v18 = vld [vmem:[#allocation4 + $0x7a4] ss:$48 sps:$4 sm:$0xff]  }
  0xb0   :  { %2225 = vmatpush1.bf16.msra.mxu0 %v5915_v21  ;;  %v6016_v21 = vld [vmem:[#allocation7 + $0x4] ss:$12 sps:$4 sm:$0xff]  }
  0xb1   :  { %1971 = vmatpush1.bf16.msra.mxu1 %v5840_v6  ;;  %2226 = vmatprep.subr.bf16.mxu0 %v5923_v22  ;;  %v6672_v6 = vld [vmem:[%s6797_s1 + $0x4] ss:$12 sps:$4 sm:$0xff]   ;;  %v5954_v22 = vld [vmem:[#allocation4 + $0x1f8] ss:$48 sps:$4 sm:$0xff]  }
  0xb2   :  { %1972 = vmatprep.subr.bf16.mxu1 %v5848_v7  ;;  %v5987_v7 = vld [vmem:[#allocation4 + $0x7a0] ss:$48 sps:$4 sm:$0xff]  }
  0xb4   :  { %2227 = vmatpush1.bf16.msra.mxu0 %v5921_v25  ;;  %v6022_v25 = vld [vmem:[#allocation7 + $0x1c] ss:$12 sps:$4 sm:$0xff]  }
  0xb5   :  { %1973 = vmatpush1.bf16.msra.mxu1 %v5846_v10  ;;  %2228 = vmatprep.subr.bf16.mxu0 %v5929_v26  ;;  %v5944_v10 = vld [vmem:[#allocation4 + $0x13c] ss:$48 sps:$4 sm:$0xff]   ;;  %v5960_v26 = vld [vmem:[#allocation4 + $0x258] ss:$48 sps:$4 sm:$0xff]  }
  0xb6   :  { %1974 = vmatprep.subr.bf16.mxu1 %v5854_v11  ;;  %v5993_v11 = vld [vmem:[#allocation4 + $0x800] ss:$48 sps:$4 sm:$0xff]  }
  0xb8   :  { %2229 = vmatpush1.bf16.msra.mxu0 %v5927_v30  ;;  %v6028_v30 = vld [vmem:[#allocation7 + $0x34] ss:$12 sps:$4 sm:$0xff]  }
  0xb9   :  { %1975 = vmatpush1.bf16.msra.mxu1 %v5852_v14  ;;  %2230 = vmatprep.subr.bf16.mxu0 %v5935_v31  ;;  %v5950_v14 = vld [vmem:[#allocation4 + $0x19c] ss:$48 sps:$4 sm:$0xff]   ;;  %v5966_v31 = vld [vmem:[#allocation4 + $0x2b8] ss:$48 sps:$4 sm:$0xff]  }
  0xba   :  { %1976 = vmatprep.subr.bf16.mxu1 %v5860_v15  ;;  %v5999_v15 = vld [vmem:[#allocation4 + $0x860] ss:$48 sps:$4 sm:$0xff]  }
  0xbc   :  { %2231 = vmatpush1.bf16.msra.mxu0 %v5933_v34  ;;  %v6034_v34 = vld [vmem:[#allocation7 + $0x4c] ss:$12 sps:$4 sm:$0xff]  }
  0xbd   :  { %1977 = vmatpush1.bf16.msra.mxu1 %v5858_v19  ;;  %2232 = vmatprep.subr.bf16.mxu0 %v5941_v35  ;;  %v5956_v19 = vld [vmem:[#allocation4 + $0x1fc] ss:$48 sps:$4 sm:$0xff]   ;;  %v5972_v35 = vld [vmem:[#allocation4 + $0x318] ss:$48 sps:$4 sm:$0xff]  }
  0xbe   :  { %1978 = vmatprep.subr.bf16.mxu1 %v5866_v20  ;;  %v6005_v20 = vld [vmem:[#allocation4 + $0x8c0] ss:$48 sps:$4 sm:$0xff]  }
  0xc0   :  { %2233 = vmatpush1.bf16.msra.mxu0 %v5939_v38  ;;  %v5978_v38 = vld [vmem:[#allocation4 + $0x378] ss:$48 sps:$4 sm:$0xff]  }
  0xc1   :  { %1979 = vmatpush1.bf16.msra.mxu1 %v5864_v23  ;;  %2234 = vmatprep.subr.bf16.mxu0 %v5947_v39  ;;  %v5962_v23 = vld [vmem:[#allocation4 + $0x25c] ss:$48 sps:$4 sm:$0xff]  }
  0xc2   :  { %1980 = vmatprep.subr.bf16.mxu1 %v5872_v24  ;;  %v6014_v24 = vld [vmem:[#allocation7] ss:$12 sps:$4 sm:$0xff]  }
  0xc3   :  { %v5986_v39 = vld [vmem:[#allocation4 + $0x3dc] ss:$48 sps:$4 sm:$0xff]  }
  0xc4   :  { %2235 = vmatpush1.bf16.msra.mxu0 %v5945_v42  ;;  %v5984_v42 = vld [vmem:[#allocation4 + $0x3d8] ss:$48 sps:$4 sm:$0xff]  }
  0xc5   :  { %1981 = vmatpush1.bf16.msra.mxu1 %v5870_v27  ;;  %2236 = vmatprep.subr.bf16.mxu0 %v5953_v43  ;;  %v5968_v27 = vld [vmem:[#allocation4 + $0x2bc] ss:$48 sps:$4 sm:$0xff]  }
  0xc6   :  { %1993 = vmatprep.subr.bf16.mxu1 %v5878_v29  ;;  %v6020_v29 = vld [vmem:[#allocation7 + $0x18] ss:$12 sps:$4 sm:$0xff]   ;;  %v5992_v43 = vld [vmem:[#allocation4 + $0x43c] ss:$48 sps:$4 sm:$0xff]  }
  0xc8   :  { %1983 = vmatmul.mubr.bf16.vlgmr.msra.gmra.mrb[4].mxu1 %v6649_v57  ;;  %2237 = vmatpush1.bf16.msra.mxu0 %v5951_v46  ;;  %v5990_v46 = vld [vmem:[#allocation4 + $0x438] ss:$48 sps:$4 sm:$0xff]  }
  0xc9   :  { %1994 = vmatpush1.bf16.msra.mxu1 %v5876_v32  ;;  %2025 = vmatprep.mubr.bf16.mxu1 %v6576_v63  ;;  %v5974_v32 = vld [vmem:[#allocation4 + $0x31c] ss:$48 sps:$4 sm:$0xff]  }
  0xca   :  { %1995 = vmatprep.subr.bf16.mxu1 %v5884_v33  ;;  %2238 = vmatprep.subr.bf16.mxu0 %v5959_v47  ;;  %v6026_v33 = vld [vmem:[#allocation7 + $0x30] ss:$12 sps:$4 sm:$0xff]  }
  0xcb   :  { %v5998_v47 = vld [vmem:[#allocation4 + $0x49c] ss:$48 sps:$4 sm:$0xff]  }
  0xcc   :  { %2239 = vmatpush1.bf16.msra.mxu0 %v5957_v50  ;;  %v5996_v50 = vld [vmem:[#allocation4 + $0x498] ss:$48 sps:$4 sm:$0xff]  }
  0xcd   :  { %1996 = vmatpush1.bf16.msra.mxu1 %v5882_v36  ;;  %2251 = vmatprep.subr.bf16.mxu0 %v5965_v51  ;;  %v5980_v36 = vld [vmem:[#allocation4 + $0x37c] ss:$48 sps:$4 sm:$0xff]  }
  0xce   :  { %1997 = vmatprep.subr.bf16.mxu1 %v5890_v37  ;;  %v6032_v37 = vld [vmem:[#allocation7 + $0x48] ss:$12 sps:$4 sm:$0xff]   ;;  %v6004_v51 = vld [vmem:[#allocation4 + $0x4fc] ss:$48 sps:$4 sm:$0xff]  }
  0xcf   :  { %2241 = vmatmul.mubr.bf16.vlgmr.msra.gmra.mrb[4].mxu0 %v6649_v57  ;;  %v5981_v57 = vld [vmem:[#allocation4 + $0x740] ss:$48 sps:$4 sm:$0xff]  }
  0xd0   :  { %2252 = vmatpush1.bf16.msra.mxu0 %v5963_v54  ;;  %2283 = vmatprep.mubr.bf16.mxu0 %v6576_v63  ;;  %v6002_v54 = vld [vmem:[#allocation4 + $0x4f8] ss:$48 sps:$4 sm:$0xff]  }
  0xd1   :  { %1998 = vmatpush1.bf16.msra.mxu1 %v5888_v40  ;;  %2253 = vmatprep.subr.bf16.mxu0 %v5971_v55  ;;  %v6038_v40 = vld [vmem:[#allocation7 + $0x60] ss:$12 sps:$4 sm:$0xff]  }
  0xd2   :  { %1999 = vmatprep.subr.bf16.mxu1 %v5896_v41  ;;  %v6046_v41 = vld [vmem:[#allocation7 + $0x7c] ss:$12 sps:$4 sm:$0xff]  }
  0xd3   :  { %v6010_v55 = vld [vmem:[#allocation4 + $0x55c] ss:$48 sps:$4 sm:$0xff]  }
  0xd4   :  { %2254 = vmatpush1.bf16.msra.mxu0 %v5969_v59  ;;  %v6008_v59 = vld [vmem:[#allocation4 + $0x558] ss:$48 sps:$4 sm:$0xff]  }
  0xd5   :  { %2000 = vmatpush1.bf16.msra.mxu1 %v5894_v44  ;;  %2255 = vmatprep.subr.bf16.mxu0 %v5977_v60  ;;  %v6044_v44 = vld [vmem:[#allocation7 + $0x78] ss:$12 sps:$4 sm:$0xff]   ;;  %v6013_v60 = vld [vmem:[#allocation4 + $0x5bc] ss:$48 sps:$4 sm:$0xff]  }
  0xd6   :  { %2001 = vmatprep.subr.bf16.mxu1 %v5902_v45  ;;  %v6052_v45 = vld [vmem:[#allocation7 + $0x94] ss:$12 sps:$4 sm:$0xff]  }
  0xd8   :  { %2256 = vmatpush1.bf16.msra.mxu0 %v5975_v0  ;;  %v6011_v0 = vld [vmem:[#allocation4 + $0x5b8] ss:$48 sps:$4 sm:$0xff]  }
  0xd9   :  { %2002 = vmatpush1.bf16.msra.mxu1 %v5900_v48  ;;  %2257 = vmatprep.subr.bf16.mxu0 %v5983_v1  ;;  %v6050_v48 = vld [vmem:[#allocation7 + $0x90] ss:$12 sps:$4 sm:$0xff]  }
  0xda   :  { %2003 = vmatprep.subr.bf16.mxu1 %v5908_v49  ;;  %v6058_v49 = vld [vmem:[#allocation7 + $0xac] ss:$12 sps:$4 sm:$0xff]  }
  0xdb   :  { %v6019_v1 = vld [vmem:[#allocation4 + $0x61c] ss:$48 sps:$4 sm:$0xff]  }
  0xdc   :  { %2258 = vmatpush1.bf16.msra.mxu0 %v5981_v57  ;;  %v6082_v57 = vld [vmem:[#allocation7 + $0x10c] ss:$12 sps:$4 sm:$0xff]  }
  0xdd   :  { %2004 = vmatpush1.bf16.msra.mxu1 %v5906_v52  ;;  %2259 = vmatprep.subr.bf16.mxu0 %v5989_v18  ;;  %v6056_v52 = vld [vmem:[#allocation7 + $0xa8] ss:$12 sps:$4 sm:$0xff]   ;;  %v6025_v18 = vld [vmem:[#allocation4 + $0x67c] ss:$48 sps:$4 sm:$0xff]  }
  0xde   :  { %2005 = vmatprep.subr.bf16.mxu1 %v5914_v53  ;;  %v6064_v53 = vld [vmem:[#allocation7 + $0xc4] ss:$12 sps:$4 sm:$0xff]  }
  0xe0   :  { %2260 = vmatpush1.bf16.msra.mxu0 %v5987_v7  ;;  %v6679_v7 = vld [vmem:[%s6797_s1] ss:$12 sps:$4 sm:$0xff]  }
  0xe1   :  { %2006 = vmatpush1.bf16.msra.mxu1 %v5912_v56  ;;  %2261 = vmatprep.subr.bf16.mxu0 %v5995_v9  ;;  %v6062_v56 = vld [vmem:[#allocation7 + $0xc0] ss:$12 sps:$4 sm:$0xff]  }
  0xe2   :  { %2007 = vmatprep.subr.bf16.mxu1 %v5920_v58  ;;  %v6070_v58 = vld [vmem:[#allocation7 + $0xdc] ss:$12 sps:$4 sm:$0xff]  }
  0xe3   :  { %v6031_v9 = vld [vmem:[#allocation4 + $0x6dc] ss:$48 sps:$4 sm:$0xff]  }
  0xe4   :  { %2262 = vmatpush1.bf16.msra.mxu0 %v5993_v11  ;;  %v6094_v11 = vld [vmem:[#allocation7 + $0x13c] ss:$12 sps:$4 sm:$0xff]  }
  0xe5   :  { %2008 = vmatpush1.bf16.msra.mxu1 %v5918_v61  ;;  %2263 = vmatprep.subr.bf16.mxu0 %v6001_v12  ;;  %v6068_v61 = vld [vmem:[#allocation7 + $0xd8] ss:$12 sps:$4 sm:$0xff]  }
  0xe6   :  { %2122 = vmatprep.subr.bf16.mxu1 %v5926_v62  ;;  %v6076_v62 = vld [vmem:[#allocation7 + $0xf4] ss:$12 sps:$4 sm:$0xff]   ;;  %v6029_v12 = vld [vmem:[#allocation4 + $0x6d8] ss:$48 sps:$4 sm:$0xff]  }
  0xe8   :  { %2026 = vmatmul.mubr.bf16.vlgmr.msra.gmra.mrb[4].mxu1 %v6658_v28  ;;  %2264 = vmatpush1.bf16.msra.mxu0 %v5999_v15  ;;  %v6100_v15 = vld [vmem:[#allocation7 + $0x154] ss:$12 sps:$4 sm:$0xff]  }
  0xe9   :  { %2123 = vmatpush1.bf16.msra.mxu1 %v5924_v2  ;;  %2154 = vmatprep.mubr.bf16.mxu1 %v6672_v6  ;;  %v6074_v2 = vld [vmem:[#allocation7 + $0xf0] ss:$12 sps:$4 sm:$0xff]  }
  0xea   :  { %2124 = vmatprep.subr.bf16.mxu1 %v5932_v3  ;;  %2265 = vmatprep.subr.bf16.mxu0 %v6007_v16  ;;  %v6017_v3 = vld [vmem:[#allocation4 + $0x618] ss:$48 sps:$4 sm:$0xff]  }
  0xeb   :  { %v6035_v16 = vld [vmem:[#allocation4 + $0x738] ss:$48 sps:$4 sm:$0xff]  }
  0xec   :  { %2266 = vmatpush1.bf16.msra.mxu0 %v6005_v20  ;;  %v6106_v20 = vld [vmem:[#allocation7 + $0x16c] ss:$12 sps:$4 sm:$0xff]  }
  0xed   :  { %2125 = vmatpush1.bf16.msra.mxu1 %v5930_v4  ;;  %4353 = vmatprep.subr.bf16.mxu0 %v6016_v21  ;;  %v6080_v4 = vld [vmem:[#allocation7 + $0x108] ss:$12 sps:$4 sm:$0xff]  }
  0xee   :  { %2126 = vmatprep.subr.bf16.mxu1 %v5938_v5  ;;  %v6088_v5 = vld [vmem:[#allocation7 + $0x124] ss:$12 sps:$4 sm:$0xff]   ;;  %v6041_v21 = vld [vmem:[#allocation4 + $0x798] ss:$48 sps:$4 sm:$0xff]  }
  0xef   :  { %2284 = vmatmul.mubr.bf16.vlgmr.msra.gmra.mrb[4].mxu0 %v6658_v28  ;;  %v6040_v28 = vld [vmem:[#allocation7 + $0x64] ss:$12 sps:$4 sm:$0xff]  }
  0xf0   :  { %4354 = vmatpush1.bf16.msra.mxu0 %v6014_v24  ;;  %v6136_v24 = vld [vmem:[#allocation7 + $0x184] ss:$12 sps:$4 sm:$0xff]  }
  0xf1   :  { %2127 = vmatpush1.bf16.msra.mxu1 %v5936_v8  ;;  %4355 = vmatprep.subr.bf16.mxu0 %v6022_v25  ;;  %v6023_v8 = vld [vmem:[#allocation4 + $0x678] ss:$48 sps:$4 sm:$0xff]  }
  0xf2   :  { %2128 = vmatprep.subr.bf16.mxu1 %v5944_v10  ;;  %v6086_v10 = vld [vmem:[#allocation7 + $0x120] ss:$12 sps:$4 sm:$0xff]   ;;  %v6047_v25 = vld [vmem:[#allocation4 + $0x7f8] ss:$48 sps:$4 sm:$0xff]  }
  0xf4   :  { %4356 = vmatpush1.bf16.msra.mxu0 %v6020_v29  ;;  %v6061_v29 = vld [vmem:[#allocation4 + $0x8bc] ss:$48 sps:$4 sm:$0xff]  }
  0xf5   :  { %2129 = vmatpush1.bf16.msra.mxu1 %v5942_v13  ;;  %4357 = vmatprep.subr.bf16.mxu0 %v6028_v30  ;;  %v6037_v13 = vld [vmem:[#allocation4 + $0x73c] ss:$48 sps:$4 sm:$0xff]   ;;  %v6059_v30 = vld [vmem:[#allocation4 + $0x8b8] ss:$48 sps:$4 sm:$0xff]  }
  0xf6   :  { %2130 = vmatprep.subr.bf16.mxu1 %v5950_v14  ;;  %v6092_v14 = vld [vmem:[#allocation7 + $0x138] ss:$12 sps:$4 sm:$0xff]  }
  0xf8   :  { %4358 = vmatpush1.bf16.msra.mxu0 %v6026_v33  ;;  %v6073_v33 = vld [vmem:[#allocation4 + $0x8c] ss:$48 sps:$4 sm:$0xff]  }
  0xf9   :  { %2131 = vmatpush1.bf16.msra.mxu1 %v5948_v17  ;;  %4359 = vmatprep.subr.bf16.mxu0 %v6034_v34  ;;  %v6043_v17 = vld [vmem:[#allocation4 + $0x79c] ss:$48 sps:$4 sm:$0xff]   ;;  %v6686_v34 = vld [vmem:[%s6797_s1 + $0x8] ss:$12 sps:$4 sm:$0xff]  }
  0xfa   :  { %2132 = vmatprep.subr.bf16.mxu1 %v5956_v19  ;;  %v6098_v19 = vld [vmem:[#allocation7 + $0x150] ss:$12 sps:$4 sm:$0xff]  }
  0xfc   :  { %4360 = vmatpush1.bf16.msra.mxu0 %v6032_v37  ;;  %v6077_v37 = vld [vmem:[#allocation4 + $0xe8] ss:$48 sps:$4 sm:$0xff]  }
  0xfd   :  { %2133 = vmatpush1.bf16.msra.mxu1 %v5954_v22  ;;  %4361 = vmatprep.subr.bf16.mxu0 %v6040_v28  ;;  %v6049_v22 = vld [vmem:[#allocation4 + $0x7fc] ss:$48 sps:$4 sm:$0xff]   ;;  %v348_v28 = vlaneseq }
  0xfe   :  { %2134 = vmatprep.subr.bf16.mxu1 %v5962_v23  ;;  %v6104_v23 = vld [vmem:[#allocation7 + $0x168] ss:$12 sps:$4 sm:$0xff]  }
 0x100   :  { %4362 = vmatpush1.bf16.msra.mxu0 %v6038_v40  ;;  %v6690_v40 = vshrl.u32 %v348_v28, 7  ;;  %v6122_v28 = vld [vmem:[#allocation4 + $0x4a8] ss:$48 sps:$4 sm:$0xff]  }
 0x101   :  { %2135 = vmatpush1.bf16.msra.mxu1 %v5960_v26  ;;  %4363 = vmatprep.subr.bf16.mxu0 %v6046_v41  ;;  %v6055_v26 = vld [vmem:[#allocation4 + $0x85c] ss:$48 sps:$4 sm:$0xff]  }
 0x102   :  { %2136 = vmatprep.subr.bf16.mxu1 %v5968_v27  ;;  %v6053_v27 = vld [vmem:[#allocation4 + $0x858] ss:$48 sps:$4 sm:$0xff]   ;;  %v6091_v41 = vld [vmem:[#allocation4 + $0x1ac] ss:$48 sps:$4 sm:$0xff]  }
 0x104   :  { %4364 = vmatpush1.bf16.msra.mxu0 %v6044_v44  ;;  %v6097_v44 = vld [vmem:[#allocation4 + $0x20c] ss:$48 sps:$4 sm:$0xff]  }
 0x105   :  { %2137 = vmatpush1.bf16.msra.mxu1 %v5966_v31  ;;  %4365 = vmatprep.subr.bf16.mxu0 %v6052_v45  ;;  %v6067_v31 = vld [vmem:[#allocation4 + $0x2c] ss:$48 sps:$4 sm:$0xff]   ;;  %v6701_v45 = vsub.s32 1, %v6690_v40 }
 0x106   :  { %2138 = vmatprep.subr.bf16.mxu1 %v5974_v32  ;;  %v6065_v32 = vld [vmem:[#allocation4 + $0x28] ss:$48 sps:$4 sm:$0xff]  }
 0x108   :  { %4366 = vmatpush1.bf16.msra.mxu0 %v6050_v48  ;;  %v6103_v48 = vld [vmem:[#allocation4 + $0x26c] ss:$48 sps:$4 sm:$0xff]  }
 0x109   :  { %2139 = vmatpush1.bf16.msra.mxu1 %v5972_v35  ;;  %4367 = vmatprep.subr.bf16.mxu0 %v6058_v49  ;;  %v6071_v35 = vld [vmem:[#allocation4 + $0x88] ss:$48 sps:$4 sm:$0xff]  }
 0x10a   :  { %2140 = vmatprep.subr.bf16.mxu1 %v5980_v36  ;;  %v6079_v36 = vld [vmem:[#allocation4 + $0xec] ss:$48 sps:$4 sm:$0xff]  }
 0x10c   :  { %4368 = vmatpush1.bf16.msra.mxu0 %v6056_v52 }
 0x10d   :  { %2141 = vmatpush1.bf16.msra.mxu1 %v5978_v38  ;;  %4369 = vmatprep.subr.bf16.mxu0 %v6064_v53  ;;  %v6085_v38 = vld [vmem:[#allocation4 + $0x14c] ss:$48 sps:$4 sm:$0xff]   ;;  %v6101_v53 = vld [vmem:[#allocation4 + $0x268] ss:$48 sps:$4 sm:$0xff]  }
 0x10e   :  { %2142 = vmatprep.subr.bf16.mxu1 %v5986_v39  ;;  %v6083_v39 = vld [vmem:[#allocation4 + $0x148] ss:$48 sps:$4 sm:$0xff]  }
 0x110   :  { %4370 = vmatpush1.bf16.msra.mxu0 %v6062_v56 }
 0x111   :  { %2143 = vmatpush1.bf16.msra.mxu1 %v5984_v42  ;;  %4371 = vmatprep.subr.bf16.mxu0 %v6070_v58  ;;  %v6089_v42 = vld [vmem:[#allocation4 + $0x1a8] ss:$48 sps:$4 sm:$0xff]  }
 0x112   :  { %2144 = vmatprep.subr.bf16.mxu1 %v5992_v43  ;;  %v6695_v43 = vld [vmem:[%s6799_s3] sm:$0xff] }
 0x113   :  { %v355_v49 = vrot.slane %v6695_v43, %v6701_v45 }
 0x114   :  { %4372 = vmatpush1.bf16.msra.mxu0 %v6068_v61  ;;  %v6107_v61 = vld [vmem:[#allocation4 + $0x2c8] ss:$48 sps:$4 sm:$0xff]  }
 0x115   :  { %2145 = vmatpush1.bf16.msra.mxu1 %v5990_v46  ;;  %4373 = vmatprep.subr.bf16.mxu0 %v6076_v62  ;;  %v6095_v46 = vld [vmem:[#allocation4 + $0x208] ss:$48 sps:$4 sm:$0xff]  }
 0x116   :  { %2146 = vmatprep.subr.bf16.mxu1 %v5998_v47 }
 0x118   :  { %4374 = vmatpush1.bf16.msra.mxu0 %v6074_v2  ;;  %v6112_v2 = vld [vmem:[#allocation4 + $0x32c] ss:$48 sps:$4 sm:$0xff]  }
 0x119   :  { %2147 = vmatpush1.bf16.msra.mxu1 %v5996_v50  ;;  %4375 = vmatprep.subr.bf16.mxu0 %v6082_v57 }
 0x11a   :  { %2148 = vmatprep.subr.bf16.mxu1 %v6004_v51 }
 0x11c   :  { %4376 = vmatpush1.bf16.msra.mxu0 %v6080_v4  ;;  %v6110_v4 = vld [vmem:[#allocation4 + $0x328] ss:$48 sps:$4 sm:$0xff]  }
 0x11d   :  { %2149 = vmatpush1.bf16.msra.mxu1 %v6002_v54  ;;  %4377 = vmatprep.subr.bf16.mxu0 %v6088_v5  ;;  %v6109_v54 = vld [vmem:[#allocation4 + $0x2cc] ss:$48 sps:$4 sm:$0xff]  }
 0x11e   :  { %2150 = vmatprep.subr.bf16.mxu1 %v6010_v55  ;;  %v6134_v5 = vld [vmem:[#allocation7 + $0x180] ss:$12 sps:$4 sm:$0xff]  }
 0x120   :  { %4378 = vmatpush1.bf16.msra.mxu0 %v6086_v10  ;;  %v6113_v10 = vld [vmem:[#allocation4 + $0x388] ss:$48 sps:$4 sm:$0xff]  }
 0x121   :  { %2151 = vmatpush1.bf16.msra.mxu1 %v6008_v59  ;;  %4379 = vmatprep.subr.bf16.mxu0 %v6094_v11  ;;  %v6140_v11 = vld [vmem:[#allocation7 + $0x198] ss:$12 sps:$4 sm:$0xff]  }
 0x122   :  { %2152 = vmatprep.subr.bf16.mxu1 %v6013_v60 }
 0x124   :  { %4380 = vmatpush1.bf16.msra.mxu0 %v6092_v14  ;;  %v366_v14 = vsub.s32 4, %v6690_v40 }
 0x125   :  { %2153 = vmatpush1.bf16.msra.mxu1 %v6011_v0  ;;  %4381 = vmatprep.subr.bf16.mxu0 %v6100_v15  ;;  %v370_v15 = vsub.s32 5, %v6690_v40 }
 0x126   :  { %2165 = vmatprep.subr.bf16.mxu1 %v6019_v1 }
 0x128   :  { %2155 = vmatmul.mubr.bf16.vlgmr.msra.gmra.mrb[8].mxu1 %v6679_v7  ;;  %4382 = vmatpush1.bf16.msra.mxu0 %v6098_v19  ;;  %v6121_v19 = vld [vmem:[#allocation4 + $0x44c] ss:$48 sps:$4 sm:$0xff]  }
 0x129   :  { %2166 = vmatpush1.bf16.msra.mxu1 %v6017_v3  ;;  %2197 = vmatprep.mubr.bf16.mxu1 %v6576_v63 }
 0x12a   :  { %2167 = vmatprep.subr.bf16.mxu1 %v6025_v18  ;;  %4383 = vmatprep.subr.bf16.mxu0 %v6106_v20  ;;  %v6154_v20 = vld [vmem:[#allocation7 + $0x1cc] ss:$12 sps:$4 sm:$0xff]  }
 0x12c   :  { %4384 = vmatpush1.bf16.msra.mxu0 %v6104_v23  ;;  %v6119_v23 = vld [vmem:[#allocation4 + $0x448] ss:$48 sps:$4 sm:$0xff]  }
 0x12d   :  { %2168 = vmatpush1.bf16.msra.mxu1 %v6023_v8  ;;  %4396 = vmatprep.subr.bf16.mxu0 %v6136_v24  ;;  %v6115_v8 = vld [vmem:[#allocation4 + $0x38c] ss:$48 sps:$4 sm:$0xff]   ;;  %v6152_v24 = vld [vmem:[#allocation7 + $0x1c8] ss:$12 sps:$4 sm:$0xff]  }
 0x12e   :  { %2169 = vmatprep.subr.bf16.mxu1 %v6031_v9  ;;  %v6142_v9 = vld [vmem:[#allocation7 + $0x19c] ss:$12 sps:$4 sm:$0xff]  }
 0x131   :  { %2170 = vmatpush1.bf16.msra.mxu1 %v6029_v12  ;;  %v6118_v12 = vld [vmem:[#allocation4 + $0x3ec] ss:$48 sps:$4 sm:$0xff]  }
 0x132   :  { %2171 = vmatprep.subr.bf16.mxu1 %v6037_v13  ;;  %v6148_v13 = vld [vmem:[#allocation7 + $0x1b4] ss:$12 sps:$4 sm:$0xff]  }
 0x135   :  { %2172 = vmatpush1.bf16.msra.mxu1 %v6035_v16  ;;  %v6116_v16 = vld [vmem:[#allocation4 + $0x3e8] ss:$48 sps:$4 sm:$0xff]  }
 0x136   :  { %2173 = vmatprep.subr.bf16.mxu1 %v6043_v17  ;;  %v6146_v17 = vld [vmem:[#allocation7 + $0x1b0] ss:$12 sps:$4 sm:$0xff]  }
 0x139   :  { %2174 = vmatpush1.bf16.msra.mxu1 %v6041_v21  ;;  %v367_v21 = vrot.slane %v6695_v43, %v366_v14  ;;  %v6196_v14 = vld [vmem:[#allocation7 + $0x288] ss:$12 sps:$4 sm:$0xff]  }
 0x13a   :  { %2175 = vmatprep.subr.bf16.mxu1 %v6049_v22  ;;  %v371_v22 = vrot.slane %v6695_v43, %v370_v15  ;;  %v6203_v15 = vld [vmem:[#allocation7 + $0x2a4] ss:$12 sps:$4 sm:$0xff]  }
 0x13d   :  { %2176 = vmatpush1.bf16.msra.mxu1 %v6047_v25  ;;  %v6124_v25 = vld [vmem:[#allocation4 + $0x4ac] ss:$48 sps:$4 sm:$0xff]  }
 0x13e   :  { %2177 = vmatprep.subr.bf16.mxu1 %v6055_v26  ;;  %v6160_v26 = vld [vmem:[#allocation7 + $0x1e4] ss:$12 sps:$4 sm:$0xff]  }
 0x141   :  { %2178 = vmatpush1.bf16.msra.mxu1 %v6053_v27 }
 0x142   :  { %2179 = vmatprep.subr.bf16.mxu1 %v6061_v29 }
 0x145   :  { %2180 = vmatpush1.bf16.msra.mxu1 %v6059_v30 }
 0x146   :  { %2294 = vmatprep.subr.bf16.mxu1 %v6067_v31 }
 0x148   :  { %2198 = vmatmul.mubr.bf16.vlgmr.msra.gmra.mrb[8].mxu1 %v6686_v34 }
 0x149   :  { %2295 = vmatpush1.bf16.msra.mxu1 %v6065_v32  ;;  %2326 = vmatprep.mubr.bf16.mxu1 %v6672_v6  ;;  %v6698_v6 = vsub.s32 0, %v6690_v40 }
 0x14a   :  { %2296 = vmatprep.subr.bf16.mxu1 %v6073_v33  ;;  %v6158_v33 = vld [vmem:[#allocation7 + $0x1e0] ss:$12 sps:$4 sm:$0xff]  }
 0x14b   :  { %v351_v47 = vrot.slane %v6695_v43, %v6698_v6 }
 0x14d   :  { %2297 = vmatpush1.bf16.msra.mxu1 %v6071_v35 }
 0x14e   :  { %2298 = vmatprep.subr.bf16.mxu1 %v6079_v36 }
 0x151   :  { %2299 = vmatpush1.bf16.msra.mxu1 %v6077_v37 }
 0x152   :  { %2300 = vmatprep.subr.bf16.mxu1 %v6085_v38 }
 0x155   :  { %2301 = vmatpush1.bf16.msra.mxu1 %v6083_v39 }
 0x156   :  { %2302 = vmatprep.subr.bf16.mxu1 %v6091_v41  ;;  %v6166_v41 = vld [vmem:[#allocation7 + $0x1fc] ss:$12 sps:$4 sm:$0xff]  }
 0x159   :  { %2303 = vmatpush1.bf16.msra.mxu1 %v6089_v42  ;;  %v6127_v42 = vld [vmem:[#allocation4 + $0x50c] ss:$48 sps:$4 sm:$0xff]  }
 0x15a   :  { %2304 = vmatprep.subr.bf16.mxu1 %v6097_v44 }
 0x15b   :  { %v1941_v50 = vpop.f32.mrb[0].mxu1 }
 0x15c   :  { %v5592_v51 = vadd.f32 %v1941_v50, %v351_v47  ;;  %v1943_v52 = vpop.f32.mrb[1].mxu1  ;;  %v6130_v50 = vld [vmem:[#allocation4 + $0x56c] ss:$48 sps:$4 sm:$0xff]  }
 0x15d   :  { %v5593_v55 = vadd.f32 %v1943_v52, %v355_v49  ;;  %v1945_v56 = vpop.f32.mrb[2].mxu1  ;;  %2305 = vmatpush1.bf16.msra.mxu1 %v6095_v46  ;;  %v6172_v52 = vld [vmem:[#allocation7 + $0x214] ss:$12 sps:$4 sm:$0xff]  }
 0x15e   :  { %v5594_v58 = vadd.f32 %v1945_v56, %v351_v47  ;;  %v1947_v59 = vpop.f32.mrb[3].mxu1  ;;  %2306 = vmatprep.subr.bf16.mxu1 %v6103_v48  ;;  %v2380_v62 = vmax.f32 %v5592_v51, 0.0  ;;  %v6125_v47 = vld [vmem:[#allocation4 + $0x508] ss:$48 sps:$4 sm:$0xff]  }
 0x15f   :  { %v5595_v60 = vadd.f32 %v1947_v59, %v355_v49  ;;  %v2381_v0 = vmax.f32 %v5593_v55, 0.0  ;;  %v6164_v49 = vld [vmem:[#allocation7 + $0x1f8] ss:$12 sps:$4 sm:$0xff]   ;;  %v6133_v55 = vld [vmem:[#allocation4 + $0x5cc] ss:$48 sps:$4 sm:$0xff]  }
 0x160   :  { %v2392_v1 = vmax.f32 %v5594_v58, 0.0  ;;  %v6178_v56 = vld [vmem:[#allocation7 + $0x22c] ss:$12 sps:$4 sm:$0xff]   ;;  %v6176_v59 = vld [vmem:[#allocation7 + $0x228] ss:$12 sps:$4 sm:$0xff]  }
 0x161   :  { %v2393_v3 = vmax.f32 %v5595_v60, 0.0  ;;  %2307 = vmatpush1.bf16.msra.mxu1 %v6101_v53  ;;  %v6128_v53 = vld [vmem:[#allocation4 + $0x568] ss:$48 sps:$4 sm:$0xff]   ;;  %v6139_v60 = vld [vmem:[#allocation4 + $0x62c] ss:$48 sps:$4 sm:$0xff]  }
 0x162   :  { %v6707_v57 = vpack.c.bf16 %v2392_v1, %v2380_v62  ;;  %2308 = vmatprep.subr.bf16.mxu1 %v6109_v54  ;;  %v2113_v27 = vpop.f32.mrb[0].mxu0  ;;  %v6170_v54 = vld [vmem:[#allocation7 + $0x210] ss:$12 sps:$4 sm:$0xff]   ;;  %v6131_v58 = vld [vmem:[#allocation4 + $0x5c8] ss:$48 sps:$4 sm:$0xff]  }
 0x163   :  { %v6709_v18 = vpack.c.bf16 %v2393_v3, %v2381_v0  ;;  %v5600_v29 = vadd.f32 %v2113_v27, %v367_v21  ;;  %v2115_v30 = vpop.f32.mrb[1].mxu0  ;;  %v6182_v62 = vld [vmem:[#allocation7 + $0x240] ss:$12 sps:$4 sm:$0xff]   ;;  %v6137_v0 = vld [vmem:[#allocation4 + $0x628] ss:$48 sps:$4 sm:$0xff]  }
 0x164   :  { %v5601_v31 = vadd.f32 %v2115_v30, %v371_v22  ;;  %v2117_v32 = vpop.f32.mrb[2].mxu0  ;;  %v6188_v1 = vld [vmem:[#allocation7 + $0x25c] ss:$12 sps:$4 sm:$0xff]   ;;  %v6186_v3 = vld [vmem:[#allocation7 + $0x258] ss:$12 sps:$4 sm:$0xff]  }
 0x165   :  { %2309 = vmatpush1.bf16.msra.mxu1 %v6107_v61  ;;  %4385 = vmatprep.mubr.bf16.mxu0 %v6709_v18  ;;  %v2384_v35 = vmax.f32 %v5600_v29, 0.0  ;;  %v5602_v36 = vadd.f32 %v2117_v32, %v367_v21  ;;  %v2119_v37 = vpop.f32.mrb[3].mxu0  ;;  %v6184_v61 = vld [vmem:[#allocation7 + $0x244] ss:$12 sps:$4 sm:$0xff]   ;;  %v6181_v27 = vld [vmem:[#allocation4 + $0x8cc] ss:$48 sps:$4 sm:$0xff]  }
 0x166   :  { %4386 = vmatmul.mubr.bf16.vlgmr.msra.gmra.mrb[8].mxu0 %v6707_v57  ;;  %2310 = vmatprep.subr.bf16.mxu1 %v6112_v2  ;;  %v2385_v38 = vmax.f32 %v5601_v31, 0.0  ;;  %v5603_v39 = vadd.f32 %v2119_v37, %v371_v22  ;;  %v6145_v2 = vld [vmem:[#allocation4 + $0x68c] ss:$48 sps:$4 sm:$0xff]   ;;  %v6206_v21 = vld [vmem:[#allocation7 + $0x2b8] ss:$12 sps:$4 sm:$0xff]  }
 0x167   :  { %4397 = vmatpush1.bf16.msra.mxu0 %v6134_v5  ;;  %v2396_v44 = vmax.f32 %v5602_v36, 0.0  ;;  %v6151_v5 = vld [vmem:[#allocation4 + $0x6ec] ss:$48 sps:$4 sm:$0xff]   ;;  %v6216_v29 = vld [vmem:[#allocation7 + $0x2e8] ss:$12 sps:$4 sm:$0xff]  }
 0x168   :  { %4398 = vmatprep.subr.bf16.mxu0 %v6142_v9  ;;  %v2397_v46 = vmax.f32 %v5603_v39, 0.0  ;;  %v6149_v9 = vld [vmem:[#allocation4 + $0x6e8] ss:$48 sps:$4 sm:$0xff]   ;;  %v6175_v22 = vld [vmem:[#allocation4 + $0x86c] ss:$48 sps:$4 sm:$0xff]  }
 0x169   :  { %2311 = vmatpush1.bf16.msra.mxu1 %v6110_v4  ;;  %v6717_v48 = vpack.c.bf16 %v2396_v44, %v2384_v35  ;;  %v6143_v4 = vld [vmem:[#allocation4 + $0x688] ss:$48 sps:$4 sm:$0xff]   ;;  %v6223_v31 = vld [vmem:[#allocation7 + $0x304] ss:$12 sps:$4 sm:$0xff]   ;;  %v6190_v35 = vld [vmem:[#allocation7 + $0xe0] ss:$12 sps:$4 sm:$0xff]  }
 0x16a   :  { %2312 = vmatprep.subr.bf16.mxu1 %v6115_v8  ;;  %v6719_v51 = vpack.c.bf16 %v2397_v46, %v2385_v38  ;;  %v6193_v8 = vld [vmem:[#allocation7 + $0x274] ss:$12 sps:$4 sm:$0xff]   ;;  %v6179_v30 = vld [vmem:[#allocation4 + $0x8c8] ss:$48 sps:$4 sm:$0xff]   ;;  %v6200_v38 = vld [vmem:[#allocation7 + $0x110] ss:$12 sps:$4 sm:$0xff]  }
 0x16b   :  { %4399 = vmatpush1.bf16.msra.mxu0 %v6140_v11  ;;  %v6157_v11 = vld [vmem:[#allocation4 + $0x74c] ss:$48 sps:$4 sm:$0xff]   ;;  %v6185_v32 = vld [vmem:[#allocation7 + $0xc8] ss:$12 sps:$4 sm:$0xff]   ;;  %v6195_v37 = vld [vmem:[#allocation7 + $0xf8] ss:$12 sps:$4 sm:$0xff]  }
 0x16c   :  { %4400 = vmatprep.subr.bf16.mxu0 %v6148_v13  ;;  %v6155_v13 = vld [vmem:[#allocation4 + $0x748] ss:$48 sps:$4 sm:$0xff]   ;;  %v6194_v36 = vld [vmem:[#allocation7 + $0x20] ss:$12 sps:$4 sm:$0xff]   ;;  %v6204_v39 = vld [vmem:[#allocation7 + $0x50] ss:$12 sps:$4 sm:$0xff]  }
 0x16d   :  { %2313 = vmatpush1.bf16.msra.mxu1 %v6113_v10  ;;  %v6191_v10 = vld [vmem:[#allocation7 + $0x270] ss:$12 sps:$4 sm:$0xff]   ;;  %v6209_v44 = vld [vmem:[#allocation7 + $0x68] ss:$12 sps:$4 sm:$0xff]  }
 0x16e   :  { %2314 = vmatprep.subr.bf16.mxu1 %v6118_v12  ;;  %v6198_v12 = vld [vmem:[#allocation7 + $0x28c] ss:$12 sps:$4 sm:$0xff]  }
 0x16f   :  { %4401 = vmatpush1.bf16.msra.mxu0 %v6146_v17  ;;  %v6169_v17 = vld [vmem:[#allocation4 + $0x80c] ss:$48 sps:$4 sm:$0xff]  }
 0x170   :  { %4402 = vmatprep.subr.bf16.mxu0 %v6154_v20  ;;  %v6167_v20 = vld [vmem:[#allocation4 + $0x808] ss:$48 sps:$4 sm:$0xff]  }
 0x171   :  { %2315 = vmatpush1.bf16.msra.mxu1 %v6116_v16  ;;  %v6161_v16 = vld [vmem:[#allocation4 + $0x7a8] ss:$48 sps:$4 sm:$0xff]  }
 0x172   :  { %2316 = vmatprep.subr.bf16.mxu1 %v6121_v19  ;;  %v6208_v19 = vld [vmem:[#allocation7 + $0x2bc] ss:$12 sps:$4 sm:$0xff]  }
 0x173   :  { %4403 = vmatpush1.bf16.msra.mxu0 %v6152_v24  ;;  %v6211_v24 = vld [vmem:[#allocation7 + $0x2d0] ss:$12 sps:$4 sm:$0xff]  }
 0x174   :  { %4404 = vmatprep.subr.bf16.mxu0 %v6160_v26  ;;  %v6218_v26 = vld [vmem:[#allocation7 + $0x2ec] ss:$12 sps:$4 sm:$0xff]  }
 0x175   :  { %2317 = vmatpush1.bf16.msra.mxu1 %v6119_v23  ;;  %v6213_v23 = vld [vmem:[#allocation7 + $0x2d4] ss:$12 sps:$4 sm:$0xff]  }
 0x176   :  { %2318 = vmatprep.subr.bf16.mxu1 %v6124_v25  ;;  %v6173_v25 = vld [vmem:[#allocation4 + $0x868] ss:$48 sps:$4 sm:$0xff]  }
 0x177   :  { %4405 = vmatpush1.bf16.msra.mxu0 %v6158_v33  ;;  %v6189_v33 = vld [vmem:[#allocation7 + $0x8] ss:$12 sps:$4 sm:$0xff]  }
 0x178   :  { %4406 = vmatprep.subr.bf16.mxu0 %v6166_v41  ;;  %v6205_v41 = vld [vmem:[#allocation7 + $0x128] ss:$12 sps:$4 sm:$0xff]  }
 0x179   :  { %2319 = vmatpush1.bf16.msra.mxu1 %v6122_v28  ;;  %v6199_v28 = vld [vmem:[#allocation7 + $0x38] ss:$12 sps:$4 sm:$0xff]  }
 0x17a   :  { %2320 = vmatprep.subr.bf16.mxu1 %v6127_v42  ;;  %v6726_v42 = vsub.s32 2, %v6690_v40 }
 0x17b   :  { %4407 = vmatpush1.bf16.msra.mxu0 %v6164_v49  ;;  %v6214_v49 = vld [vmem:[#allocation7 + $0x80] ss:$12 sps:$4 sm:$0xff]  }
 0x17c   :  { %4408 = vmatprep.subr.bf16.mxu0 %v6172_v52  ;;  %v359_v46 = vrot.slane %v6695_v43, %v6726_v42 }
 0x17d   :  { %2321 = vmatpush1.bf16.msra.mxu1 %v6125_v47 }
 0x17e   :  { %2322 = vmatprep.subr.bf16.mxu1 %v6130_v50  ;;  %v6215_v50 = vld [vmem:[#allocation7 + $0x158] ss:$12 sps:$4 sm:$0xff]  }
 0x17f   :  { %4409 = vmatpush1.bf16.msra.mxu0 %v6170_v54 }
 0x180   :  { %4410 = vmatprep.subr.bf16.mxu0 %v6178_v56 }
 0x181   :  { %2323 = vmatpush1.bf16.msra.mxu1 %v6128_v53 }
 0x182   :  { %2324 = vmatprep.subr.bf16.mxu1 %v6133_v55 }
 0x183   :  { %4411 = vmatpush1.bf16.msra.mxu0 %v6176_v59 }
 0x184   :  { %4412 = vmatprep.subr.bf16.mxu0 %v6184_v61  ;;  %v6220_v61 = vld [vmem:[#allocation7 + $0x170] ss:$12 sps:$4 sm:$0xff]  }
 0x185   :  { %2325 = vmatpush1.bf16.msra.mxu1 %v6131_v58  ;;  %v6219_v58 = vld [vmem:[#allocation7 + $0x98] ss:$12 sps:$4 sm:$0xff]  }
 0x186   :  { %2337 = vmatprep.subr.bf16.mxu1 %v6139_v60 }
 0x187   :  { %4413 = vmatpush1.bf16.msra.mxu0 %v6182_v62 }
 0x188   :  { %2327 = vmatmul.mubr.bf16.vlgmr.msra.gmra.mrb[12].mxu1 %v6679_v7  ;;  %4414 = vmatprep.subr.bf16.mxu0 %v6188_v1  ;;  %v6163_v7 = vld [vmem:[#allocation4 + $0x7ac] ss:$48 sps:$4 sm:$0xff]  }
 0x189   :  { %2338 = vmatpush1.bf16.msra.mxu1 %v6137_v0  ;;  %2369 = vmatprep.mubr.bf16.mxu1 %v6576_v63  ;;  %v6201_v63 = vld [vmem:[#allocation7 + $0x2a0] ss:$12 sps:$4 sm:$0xff]  }
 0x18a   :  { %2339 = vmatprep.subr.bf16.mxu1 %v6145_v2 }
 0x18b   :  { %4415 = vmatpush1.bf16.msra.mxu0 %v6186_v3 }
 0x18c   :  { %4416 = vmatprep.subr.bf16.mxu0 %v6193_v8 }
 0x18d   :  { %2340 = vmatpush1.bf16.msra.mxu1 %v6143_v4 }
 0x18e   :  { %2341 = vmatprep.subr.bf16.mxu1 %v6151_v5  ;;  %v6225_v5 = vld [vmem:[#allocation7 + $0x248] ss:$12 sps:$4 sm:$0xff]  }
 0x18f   :  { %4417 = vmatpush1.bf16.msra.mxu0 %v6191_v10  ;;  %v6228_v10 = vld [vmem:[#allocation7 + $0x31c] ss:$12 sps:$4 sm:$0xff]  }
 0x190   :  { %4418 = vmatprep.subr.bf16.mxu0 %v6198_v12  ;;  %v6230_v12 = vld [vmem:[#allocation7 + $0x260] ss:$12 sps:$4 sm:$0xff]  }
 0x191   :  { %2342 = vmatpush1.bf16.msra.mxu1 %v6149_v9  ;;  %v6221_v9 = vld [vmem:[#allocation7 + $0x300] ss:$12 sps:$4 sm:$0xff]  }
 0x192   :  { %2343 = vmatprep.subr.bf16.mxu1 %v6157_v11  ;;  %v6229_v11 = vld [vmem:[#allocation7 + $0x188] ss:$12 sps:$4 sm:$0xff]  }
 0x193   :  { %4419 = vmatpush1.bf16.msra.mxu0 %v6196_v14  ;;  %v6233_v14 = vld [vmem:[#allocation7 + $0x334] ss:$12 sps:$4 sm:$0xff]  }
 0x194   :  { %4420 = vmatprep.subr.bf16.mxu0 %v6203_v15  ;;  %v6235_v15 = vld [vmem:[#allocation7 + $0x278] ss:$12 sps:$4 sm:$0xff]  }
 0x195   :  { %2344 = vmatpush1.bf16.msra.mxu1 %v6155_v13  ;;  %v6226_v13 = vld [vmem:[#allocation7 + $0x318] ss:$12 sps:$4 sm:$0xff]  }
 0x196   :  { %2345 = vmatprep.subr.bf16.mxu1 %v6163_v7  ;;  %v6234_v7 = vld [vmem:[#allocation7 + $0x1a0] ss:$12 sps:$4 sm:$0xff]  }
 0x197   :  { %4421 = vmatpush1.bf16.msra.mxu0 %v6201_v63  ;;  %v6231_v63 = vld [vmem:[#allocation7 + $0x330] ss:$12 sps:$4 sm:$0xff]  }
 0x198   :  { %4422 = vmatprep.subr.bf16.mxu0 %v6208_v19  ;;  %v6239_v19 = vld [vmem:[#allocation7 + $0x1b8] ss:$12 sps:$4 sm:$0xff]  }
 0x199   :  { %2346 = vmatpush1.bf16.msra.mxu1 %v6161_v16  ;;  %v6742_v16 = vld [vmem:[%s6799_s3 + $0x8] sm:$0xf] }
 0x19a   :  { %2347 = vmatprep.subr.bf16.mxu1 %v6169_v17  ;;  %v6238_v17 = vld [vmem:[#allocation7 + $0x34c] ss:$12 sps:$4 sm:$0xff]  }
 0x19b   :  { %4423 = vmatpush1.bf16.msra.mxu0 %v6206_v21  ;;  %v387_v21 = vrot.slane %v6742_v16, %v6701_v45 }
 0x19c   :  { %4424 = vmatprep.subr.bf16.mxu0 %v6213_v23  ;;  %v6243_v23 = vld [vmem:[#allocation7 + $0x364] ss:$12 sps:$4 sm:$0xff]  }
 0x19d   :  { %2348 = vmatpush1.bf16.msra.mxu1 %v6167_v20  ;;  %v6240_v20 = vld [vmem:[#allocation7 + $0x290] ss:$12 sps:$4 sm:$0xff]  }
 0x19e   :  { %2349 = vmatprep.subr.bf16.mxu1 %v6175_v22  ;;  %v6236_v22 = vld [vmem:[#allocation7 + $0x348] ss:$12 sps:$4 sm:$0xff]  }
 0x19f   :  { %4425 = vmatpush1.bf16.msra.mxu0 %v6211_v24 }
 0x1a0   :  { %4426 = vmatprep.subr.bf16.mxu0 %v6218_v26 }
 0x1a1   :  { %2350 = vmatpush1.bf16.msra.mxu1 %v6173_v25  ;;  %v6244_v25 = vld [vmem:[#allocation7 + $0x1d0] ss:$12 sps:$4 sm:$0xff]  }
 0x1a2   :  { %2351 = vmatprep.subr.bf16.mxu1 %v6181_v27 }
 0x1a3   :  { %4427 = vmatpush1.bf16.msra.mxu0 %v6216_v29  ;;  %v6245_v29 = vld [vmem:[#allocation7 + $0x2a8] ss:$12 sps:$4 sm:$0xff]  }
 0x1a4   :  { %4439 = vmatprep.subr.bf16.mxu0 %v6223_v31 }
 0x1a5   :  { %2352 = vmatpush1.bf16.msra.mxu1 %v6179_v30 }
 0x1a6   :  { %5460 = vmatprep.subr.bf16.mxu1 %v6185_v32  ;;  %v6241_v32 = vld [vmem:[#allocation7 + $0x360] ss:$12 sps:$4 sm:$0xff]  }
 0x1a8   :  { %2370 = vmatmul.mubr.bf16.vlgmr.msra.gmra.mrb[12].mxu1 %v6686_v34  ;;  %v362_v34 = vsub.s32 3, %v6690_v40 }
 0x1a9   :  { %5461 = vmatpush3.bf16.msra.mxu1 %v6189_v33  ;;  %4643 = vmatprep.mubr.bf16.mxu1 %v6709_v18  ;;  %v6210_v18 = vld [vmem:[#allocation7 + $0x140] ss:$12 sps:$4 sm:$0xff]  }
 0x1aa   :  { %5462 = vmatprep.subr.bf16.mxu1 %v6190_v35  ;;  %v363_v47 = vrot.slane %v6695_v43, %v362_v34  ;;  %v6224_v43 = vld [vmem:[#allocation7 + $0xb0] ss:$12 sps:$4 sm:$0xff]  }
 0x1ad   :  { %5463 = vmatpush3.bf16.msra.mxu1 %v6194_v36 }
 0x1ae   :  { %5464 = vmatprep.subr.bf16.mxu1 %v6195_v37  ;;  %v6248_v37 = vld [vmem:[#allocation7 + $0x37c] ss:$12 sps:$4 sm:$0xff]  }
 0x1b1   :  { %5465 = vmatpush3.bf16.msra.mxu1 %v6199_v28 }
 0x1b2   :  { %5466 = vmatprep.subr.bf16.mxu1 %v6200_v38 }
 0x1b5   :  { %5467 = vmatpush3.bf16.msra.mxu1 %v6204_v39  ;;  %v6249_v39 = vld [vmem:[#allocation7 + $0x1e8] ss:$12 sps:$4 sm:$0xff]  }
 0x1b6   :  { %5468 = vmatprep.subr.bf16.mxu1 %v6205_v41 }
 0x1b9   :  { %5469 = vmatpush3.bf16.msra.mxu1 %v6209_v44  ;;  %v6250_v44 = vld [vmem:[#allocation7 + $0x2c0] ss:$12 sps:$4 sm:$0xff]  }
 0x1ba   :  { %5470 = vmatprep.subr.bf16.mxu1 %v6210_v18 }
 0x1bb   :  { %v2027_v52 = vpop.f32.mrb[4].mxu1 }
 0x1bc   :  { %v5596_v53 = vadd.f32 %v2027_v52, %v359_v46  ;;  %v2029_v54 = vpop.f32.mrb[5].mxu1  ;;  %v6254_v52 = vld [vmem:[#allocation7 + $0x200] ss:$12 sps:$4 sm:$0xff]  }
 0x1bd   :  { %v5597_v55 = vadd.f32 %v2029_v54, %v363_v47  ;;  %v2031_v56 = vpop.f32.mrb[6].mxu1  ;;  %5471 = vmatpush3.bf16.msra.mxu1 %v6214_v49  ;;  %v6253_v49 = vld [vmem:[#allocation7 + $0x394] ss:$12 sps:$4 sm:$0xff]   ;;  %v6251_v54 = vld [vmem:[#allocation7 + $0x390] ss:$12 sps:$4 sm:$0xff]  }
 0x1be   :  { %v5598_v59 = vadd.f32 %v2031_v56, %v359_v46  ;;  %v2033_v60 = vpop.f32.mrb[7].mxu1  ;;  %5472 = vmatprep.subr.bf16.mxu1 %v6215_v50  ;;  %v2382_v0 = vmax.f32 %v5596_v53, 0.0  ;;  %v6246_v46 = vld [vmem:[#allocation7 + $0x378] ss:$12 sps:$4 sm:$0xff]  }
 0x1bf   :  { %v5599_v62 = vadd.f32 %v2033_v60, %v363_v47  ;;  %v2383_v2 = vmax.f32 %v5597_v55, 0.0  ;;  %v6255_v53 = vld [vmem:[#allocation7 + $0x2d8] ss:$12 sps:$4 sm:$0xff]  }
 0x1c0   :  { %v2394_v1 = vmax.f32 %v5598_v59, 0.0  ;;  %v6258_v55 = vld [vmem:[#allocation7 + $0x3ac] ss:$12 sps:$4 sm:$0xff]   ;;  %v6256_v59 = vld [vmem:[#allocation7 + $0x3a8] ss:$12 sps:$4 sm:$0xff]  }
 0x1c1   :  { %v2395_v3 = vmax.f32 %v5599_v62, 0.0  ;;  %5473 = vmatpush3.bf16.msra.mxu1 %v6219_v58  ;;  %v6259_v56 = vld [vmem:[#allocation7 + $0x218] ss:$12 sps:$4 sm:$0xff]   ;;  %v6260_v58 = vld [vmem:[#allocation7 + $0x2f0] ss:$12 sps:$4 sm:$0xff]  }
 0x1c2   :  { %v6734_v4 = vpack.c.bf16 %v2394_v1, %v2382_v0  ;;  %5474 = vmatprep.subr.bf16.mxu1 %v6220_v61  ;;  %v2285_v24 = vpop.f32.mrb[4].mxu0  ;;  %v6263_v60 = vld [vmem:[#allocation7 + $0x3c4] ss:$12 sps:$4 sm:$0xff]   ;;  %v6265_v62 = vld [vmem:[#allocation7 + $0x3c8] ss:$12 sps:$4 sm:$0xff]  }
 0x1c3   :  { %v2407_v8 = vpack.c.bf16 %v2395_v3, %v2383_v2  ;;  %v2287_v27 = vpop.f32.mrb[5].mxu0  ;;  %v6264_v61 = vld [vmem:[#allocation7 + $0x230] ss:$12 sps:$4 sm:$0xff]   ;;  %v6261_v0 = vld [vmem:[#allocation7 + $0x3c0] ss:$12 sps:$4 sm:$0xff]  }
 0x1c4   :  { %v5609_v30 = vadd.f32 %v2287_v27, %v387_v21  ;;  %v2289_v31 = vpop.f32.mrb[6].mxu0  ;;  %v6268_v1 = vld [vmem:[#allocation7 + $0x3dc] ss:$12 sps:$4 sm:$0xff]   ;;  %v6270_v3 = vld [vmem:[#allocation7 + $0x3e0] ss:$12 sps:$4 sm:$0xff]  }
 0x1c5   :  { %4428 = vmatprep.mubr.bf16.mxu0 %v2407_v8  ;;  %5475 = vmatpush3.bf16.msra.mxu1 %v6224_v43  ;;  %v2291_v36 = vpop.f32.mrb[7].mxu0  ;;  %v6269_v2 = vld [vmem:[#allocation7 + $0x308] ss:$12 sps:$4 sm:$0xff]   ;;  %v6266_v43 = vld [vmem:[#allocation7 + $0x3d8] ss:$12 sps:$4 sm:$0xff]  }
 0x1c6   :  { %4429 = vmatmul.mubr.bf16.vlgmr.msra.gmra.mrb[8].mxu0 %v6734_v4  ;;  %5482 = vmatprep.subr.bf16.mxu1 %v6225_v5  ;;  %v2389_v28 = vmax.f32 %v5609_v30, 0.0  ;;  %v5611_v38 = vadd.f32 %v2291_v36, %v387_v21  ;;  %v6273_v5 = vld [vmem:[#allocation7 + $0x3f4] ss:$12 sps:$4 sm:$0xff]   ;;  %v6304_v30 = vld [vmem:[#allocation7 + $0x3b0] ss:$12 sps:$4 sm:$0xff]  }
 0x1c7   :  { %4440 = vmatpush1.bf16.msra.mxu0 %v6221_v9  ;;  %4471 = vmatprep.mubr.bf16.mxu0 %v6719_v51  ;;  %v6275_v9 = vld [vmem:[#allocation7 + $0x3f8] ss:$12 sps:$4 sm:$0xff]   ;;  %v6294_v21 = vld [vmem:[#allocation7 + $0x380] ss:$12 sps:$4 sm:$0xff]   ;;  %v6296_v27 = vld [vmem:[#allocation7 + $0x468] ss:$12 sps:$4 sm:$0xff]  }
 0x1c8   :  { %4644 = vmatmul.mubr.bf16.vlgmr.msra.gmra.mrb[16].mxu1 %v6707_v57  ;;  %4441 = vmatprep.subr.bf16.mxu0 %v6228_v10  ;;  %v383_v57 = vrot.slane %v6742_v16, %v6698_v6  ;;  %v2401_v18 = vmax.f32 %v5611_v38, 0.0  ;;  %v6271_v10 = vld [vmem:[#allocation7 + $0x3f0] ss:$12 sps:$4 sm:$0xff]   ;;  %v6310_v36 = vld [vmem:[#allocation7 + $0x560] ss:$12 sps:$4 sm:$0xff]  }
 0x1c9   :  { %5483 = vmatpush3.bf16.msra.mxu1 %v6229_v11  ;;  %4684 = vmatprep.mubr.bf16.mxu1 %v2407_v8  ;;  %v6274_v8 = vld [vmem:[#allocation7 + $0x320] ss:$12 sps:$4 sm:$0xff]  }
 0x1ca   :  { %5484 = vmatprep.subr.bf16.mxu1 %v6230_v12  ;;  %v5608_v26 = vadd.f32 %v2285_v24, %v383_v57  ;;  %v5610_v35 = vadd.f32 %v2289_v31, %v383_v57  ;;  %v6750_v50 = vpack.c.bf16 %v2401_v18, %v2389_v28  ;;  %v6278_v11 = vld [vmem:[#allocation7 + $0x40c] ss:$12 sps:$4 sm:$0xff]   ;;  %v6305_v31 = vld [vmem:[#allocation7 + $0x548] ss:$12 sps:$4 sm:$0xff]  }
 0x1cb   :  { %4442 = vmatpush1.bf16.msra.mxu0 %v6226_v13  ;;  %v6279_v12 = vld [vmem:[#allocation7 + $0x338] ss:$12 sps:$4 sm:$0xff]   ;;  %v6280_v13 = vld [vmem:[#allocation7 + $0x410] ss:$12 sps:$4 sm:$0xff]   ;;  %v6313_v28 = vld [vmem:[#allocation7 + $0x4b4] ss:$12 sps:$4 sm:$0xff]  }
 0x1cc   :  { %4443 = vmatprep.subr.bf16.mxu0 %v6233_v14  ;;  %v2388_v33 = vmax.f32 %v5608_v26, 0.0  ;;  %v2400_v41 = vmax.f32 %v5610_v35, 0.0  ;;  %v6276_v14 = vld [vmem:[#allocation7 + $0x408] ss:$12 sps:$4 sm:$0xff]   ;;  %v6286_v57 = vld [vmem:[#allocation7 + $0x438] ss:$12 sps:$4 sm:$0xff]  }
 0x1cd   :  { %5485 = vmatpush3.bf16.msra.mxu1 %v6234_v7  ;;  %v6284_v7 = vld [vmem:[#allocation7 + $0x350] ss:$12 sps:$4 sm:$0xff]   ;;  %v6298_v24 = vld [vmem:[#allocation7 + $0x46c] ss:$12 sps:$4 sm:$0xff]   ;;  %v6309_v35 = vld [vmem:[#allocation7 + $0x488] ss:$12 sps:$4 sm:$0xff]  }
 0x1ce   :  { %5486 = vmatprep.subr.bf16.mxu1 %v6235_v15  ;;  %v6748_v47 = vpack.c.bf16 %v2400_v41, %v2388_v33  ;;  %v6285_v15 = vld [vmem:[#allocation7 + $0x428] ss:$12 sps:$4 sm:$0xff]   ;;  %v6300_v26 = vld [vmem:[#allocation7 + $0x470] ss:$12 sps:$4 sm:$0xff]   ;;  %v6314_v38 = vld [vmem:[#allocation7 + $0x4a0] ss:$12 sps:$4 sm:$0xff]  }
 0x1cf   :  { %4444 = vmatpush1.bf16.msra.mxu0 %v6231_v63  ;;  %v6288_v63 = vld [vmem:[#allocation7 + $0x43c] ss:$12 sps:$4 sm:$0xff]   ;;  %v6319_v18 = vld [vmem:[#allocation7 + $0x4b8] ss:$12 sps:$4 sm:$0xff]  }
 0x1d0   :  { %4445 = vmatprep.subr.bf16.mxu0 %v6238_v17  ;;  %v6289_v17 = vld [vmem:[#allocation7 + $0x368] ss:$12 sps:$4 sm:$0xff]   ;;  %v6311_v41 = vld [vmem:[#allocation7 + $0x4b0] ss:$12 sps:$4 sm:$0xff]  }
 0x1d1   :  { %5487 = vmatpush3.bf16.msra.mxu1 %v6239_v19  ;;  %v6290_v19 = vld [vmem:[#allocation7 + $0x440] ss:$12 sps:$4 sm:$0xff]   ;;  %v6308_v33 = vld [vmem:[#allocation7 + $0x49c] ss:$12 sps:$4 sm:$0xff]  }
 0x1d2   :  { %5488 = vmatprep.subr.bf16.mxu1 %v6240_v20  ;;  %v6293_v20 = vld [vmem:[#allocation7 + $0x454] ss:$12 sps:$4 sm:$0xff]  }
 0x1d3   :  { %4446 = vmatpush1.bf16.msra.mxu0 %v6236_v22  ;;  %v6295_v22 = vld [vmem:[#allocation7 + $0x458] ss:$12 sps:$4 sm:$0xff]  }
 0x1d4   :  { %4447 = vmatprep.subr.bf16.mxu0 %v6243_v23  ;;  %v6291_v23 = vld [vmem:[#allocation7 + $0x450] ss:$12 sps:$4 sm:$0xff]  }
 0x1d5   :  { %5489 = vmatpush3.bf16.msra.mxu1 %v6244_v25  ;;  %v6299_v25 = vld [vmem:[#allocation7 + $0x398] ss:$12 sps:$4 sm:$0xff]  }
 0x1d6   :  { %5490 = vmatprep.subr.bf16.mxu1 %v6245_v29  ;;  %v6303_v29 = vld [vmem:[#allocation7 + $0x484] ss:$12 sps:$4 sm:$0xff]  }
 0x1d7   :  { %4448 = vmatpush1.bf16.msra.mxu0 %v6241_v32  ;;  %v6301_v32 = vld [vmem:[#allocation7 + $0x480] ss:$12 sps:$4 sm:$0xff]  }
 0x1d8   :  { %4449 = vmatprep.subr.bf16.mxu0 %v6248_v37  ;;  %v6306_v37 = vld [vmem:[#allocation7 + $0x498] ss:$12 sps:$4 sm:$0xff]  }
 0x1d9   :  { %5491 = vmatpush3.bf16.msra.mxu1 %v6249_v39  ;;  %v6315_v39 = vld [vmem:[#allocation7 + $0x578] ss:$12 sps:$4 sm:$0xff]  }
 0x1da   :  { %5492 = vmatprep.subr.bf16.mxu1 %v6250_v44  ;;  %v6318_v44 = vld [vmem:[#allocation7 + $0x4cc] ss:$12 sps:$4 sm:$0xff]  }
 0x1db   :  { %4450 = vmatpush1.bf16.msra.mxu0 %v6246_v46  ;;  %v6320_v46 = vld [vmem:[#allocation7 + $0x590] ss:$12 sps:$4 sm:$0xff]  }
 0x1dc   :  { %4451 = vmatprep.subr.bf16.mxu0 %v6253_v49  ;;  %v6316_v49 = vld [vmem:[#allocation7 + $0x4c8] ss:$12 sps:$4 sm:$0xff]  }
 0x1dd   :  { %5493 = vmatpush3.bf16.msra.mxu1 %v6254_v52  ;;  %v6323_v52 = vld [vmem:[#allocation7 + $0x4e4] ss:$12 sps:$4 sm:$0xff]  }
 0x1de   :  { %5494 = vmatprep.subr.bf16.mxu1 %v6255_v53  ;;  %v6325_v53 = vld [vmem:[#allocation7 + $0x5a8] ss:$12 sps:$4 sm:$0xff]  }
 0x1df   :  { %4452 = vmatpush1.bf16.msra.mxu0 %v6251_v54  ;;  %v6321_v54 = vld [vmem:[#allocation7 + $0x4e0] ss:$12 sps:$4 sm:$0xff]  }
 0x1e0   :  { %4453 = vmatprep.subr.bf16.mxu0 %v6258_v55  ;;  %v6328_v55 = vld [vmem:[#allocation7 + $0x4fc] ss:$12 sps:$4 sm:$0xff]  }
 0x1e1   :  { %5495 = vmatpush3.bf16.msra.mxu1 %v6259_v56  ;;  %v374_v56 = vsub.s32 6, %v6690_v40 }
 0x1e2   :  { %5496 = vmatprep.subr.bf16.mxu1 %v6260_v58  ;;  %v6329_v58 = vld [vmem:[#allocation7 + $0x4e8] ss:$12 sps:$4 sm:$0xff]  }
 0x1e3   :  { %4454 = vmatpush1.bf16.msra.mxu0 %v6256_v59  ;;  %v378_v59 = vsub.s32 7, %v6690_v40  ;;  %v6448_v40 = vld [vmem:[#allocation7 + $0x784] ss:$12 sps:$4 sm:$0xff]  }
 0x1e4   :  { %4455 = vmatprep.subr.bf16.mxu0 %v6263_v60  ;;  %v6330_v60 = vld [vmem:[#allocation7 + $0x5c0] ss:$12 sps:$4 sm:$0xff]  }
 0x1e5   :  { %5497 = vmatpush3.bf16.msra.mxu1 %v6264_v61  ;;  %v6326_v61 = vld [vmem:[#allocation7 + $0x4f8] ss:$12 sps:$4 sm:$0xff]  }
 0x1e6   :  { %5504 = vmatprep.subr.bf16.mxu1 %v6265_v62  ;;  %v6497_v62 = vld [vmem:[%s6799_s3] sm:$0xff] }
 0x1e7   :  { %4456 = vmatpush1.bf16.msra.mxu0 %v6261_v0  ;;  %v375_v0 = vrot.slane %v6497_v62, %v374_v56  ;;  %v6375_v56 = vld [vmem:[#allocation7 + $0x758] ss:$12 sps:$4 sm:$0xff]  }
 0x1e8   :  { %4685 = vmatmul.mubr.bf16.vlgmr.msra.gmra.mrb[20].mxu1 %v6734_v4  ;;  %4457 = vmatprep.subr.bf16.mxu0 %v6268_v1  ;;  %v6283_v4 = vld [vmem:[#allocation7 + $0x424] ss:$12 sps:$4 sm:$0xff]   ;;  %v6333_v1 = vld [vmem:[#allocation7 + $0x514] ss:$12 sps:$4 sm:$0xff]  }
 0x1e9   :  { %5505 = vmatpush3.bf16.msra.mxu1 %v6269_v2  ;;  %4725 = vmatprep.mubr.bf16.mxu1 %v6719_v51  ;;  %v6281_v51 = vld [vmem:[#allocation7 + $0x420] ss:$12 sps:$4 sm:$0xff]   ;;  %v379_v2 = vrot.slane %v6497_v62, %v378_v59  ;;  %v6376_v62 = vld [vmem:[#allocation7 + $0x5e8] ss:$12 sps:$4 sm:$0xff]  }
 0x1ea   :  { %5506 = vmatprep.subr.bf16.mxu1 %v6270_v3  ;;  %v6334_v3 = vld [vmem:[#allocation7 + $0x500] ss:$12 sps:$4 sm:$0xff]  }
 0x1eb   :  { %4458 = vmatpush1.bf16.msra.mxu0 %v6266_v43  ;;  %v6335_v43 = vld [vmem:[#allocation7 + $0x5d8] ss:$12 sps:$4 sm:$0xff]  }
 0x1ec   :  { %4459 = vmatprep.subr.bf16.mxu0 %v6273_v5  ;;  %v6378_v59 = vld [vmem:[#allocation7 + $0x5ec] ss:$12 sps:$4 sm:$0xff]  }
 0x1ed   :  { %5507 = vmatpush3.bf16.msra.mxu1 %v6274_v8  ;;  %v6331_v8 = vld [vmem:[#allocation7 + $0x510] ss:$12 sps:$4 sm:$0xff]  }
 0x1ee   :  { %5508 = vmatprep.subr.bf16.mxu1 %v6275_v9 }
 0x1ef   :  { %4460 = vmatpush1.bf16.msra.mxu0 %v6271_v10 }
 0x1f0   :  { %4461 = vmatprep.subr.bf16.mxu0 %v6278_v11  ;;  %v6338_v11 = vld [vmem:[#allocation7 + $0x52c] ss:$12 sps:$4 sm:$0xff]  }
 0x1f1   :  { %5509 = vmatpush3.bf16.msra.mxu1 %v6279_v12 }
 0x1f2   :  { %5510 = vmatprep.subr.bf16.mxu1 %v6280_v13 }
 0x1f3   :  { %4462 = vmatpush1.bf16.msra.mxu0 %v6276_v14  ;;  %v6339_v14 = vld [vmem:[#allocation7 + $0x518] ss:$12 sps:$4 sm:$0xff]  }
 0x1f4   :  { %4463 = vmatprep.subr.bf16.mxu0 %v6283_v4 }
 0x1f5   :  { %5511 = vmatpush3.bf16.msra.mxu1 %v6284_v7 }
 0x1f6   :  { %5512 = vmatprep.subr.bf16.mxu1 %v6285_v15 }
 0x1f7   :  { %4464 = vmatpush1.bf16.msra.mxu0 %v6281_v51  ;;  %v6340_v51 = vld [vmem:[#allocation7 + $0x5f0] ss:$12 sps:$4 sm:$0xff]  }
 0x1f8   :  { %4465 = vmatprep.subr.bf16.mxu0 %v6288_v63 }
 0x1f9   :  { %5513 = vmatpush3.bf16.msra.mxu1 %v6289_v17  ;;  %v6336_v17 = vld [vmem:[#allocation7 + $0x528] ss:$12 sps:$4 sm:$0xff]  }
 0x1fa   :  { %5514 = vmatprep.subr.bf16.mxu1 %v6290_v19 }
 0x1fb   :  { %4466 = vmatpush1.bf16.msra.mxu0 %v6286_v57  ;;  %v6343_v57 = vld [vmem:[#allocation7 + $0x544] ss:$12 sps:$4 sm:$0xff]  }
 0x1fc   :  { %4467 = vmatprep.subr.bf16.mxu0 %v6293_v20 }
 0x1fd   :  { %5515 = vmatpush3.bf16.msra.mxu1 %v6294_v21 }
 0x1fe   :  { %5516 = vmatprep.subr.bf16.mxu1 %v6295_v22  ;;  %v6344_v22 = vld [vmem:[#allocation7 + $0x530] ss:$12 sps:$4 sm:$0xff]  }
 0x1ff   :  { %4468 = vmatpush1.bf16.msra.mxu0 %v6291_v23 }
 0x200   :  { %4469 = vmatprep.subr.bf16.mxu0 %v6298_v24  ;;  %v6345_v24 = vld [vmem:[#allocation7 + $0x6c8] ss:$12 sps:$4 sm:$0xff]  }
 0x201   :  { %5517 = vmatpush3.bf16.msra.mxu1 %v6299_v25 }
 0x202   :  { %5518 = vmatprep.subr.bf16.mxu1 %v6300_v26  ;;  %v6341_v26 = vld [vmem:[#allocation7 + $0x540] ss:$12 sps:$4 sm:$0xff]  }
 0x203   :  { %4470 = vmatpush1.bf16.msra.mxu0 %v6296_v27  ;;  %v6348_v27 = vld [vmem:[#allocation7 + $0x55c] ss:$12 sps:$4 sm:$0xff]  }
 0x204   :  { %4482 = vmatprep.subr.bf16.mxu0 %v6303_v29  ;;  %v6349_v29 = vld [vmem:[#allocation7 + $0x608] ss:$12 sps:$4 sm:$0xff]  }
 0x205   :  { %5519 = vmatpush3.bf16.msra.mxu1 %v6304_v30  ;;  %v6350_v30 = vld [vmem:[#allocation7 + $0x6e0] ss:$12 sps:$4 sm:$0xff]  }
 0x206   :  { %4472 = vmatmul.mubr.bf16.vlgmr.msra.gmra.mrb[8].mxu0 %v6717_v48  ;;  %5526 = vmatprep.subr.bf16.mxu1 %v6305_v31  ;;  %v6346_v31 = vld [vmem:[#allocation7 + $0x558] ss:$12 sps:$4 sm:$0xff]  }
 0x207   :  { %4483 = vmatpush1.bf16.msra.mxu0 %v6301_v32  ;;  %v6353_v32 = vld [vmem:[#allocation7 + $0x574] ss:$12 sps:$4 sm:$0xff]  }
 0x208   :  { %4726 = vmatmul.mubr.bf16.vlgmr.msra.gmra.mrb[24].mxu1 %v6717_v48  ;;  %4484 = vmatprep.subr.bf16.mxu0 %v6308_v33  ;;  %v6324_v48 = vld [vmem:[#allocation7 + $0x4d0] ss:$12 sps:$4 sm:$0xff]   ;;  %v6354_v33 = vld [vmem:[#allocation7 + $0x620] ss:$12 sps:$4 sm:$0xff]  }
 0x209   :  { %5527 = vmatpush3.bf16.msra.mxu1 %v6309_v35  ;;  %v6355_v35 = vld [vmem:[#allocation7 + $0x6f8] ss:$12 sps:$4 sm:$0xff]  }
 0x20a   :  { %5528 = vmatprep.subr.bf16.mxu1 %v6310_v36  ;;  %v6351_v36 = vld [vmem:[#allocation7 + $0x570] ss:$12 sps:$4 sm:$0xff]  }
 0x20b   :  { %4485 = vmatpush1.bf16.msra.mxu0 %v6306_v37  ;;  %v6358_v37 = vld [vmem:[#allocation7 + $0x58c] ss:$12 sps:$4 sm:$0xff]  }
 0x20c   :  { %4486 = vmatprep.subr.bf16.mxu0 %v6313_v28  ;;  %v6359_v28 = vld [vmem:[#allocation7 + $0x638] ss:$12 sps:$4 sm:$0xff]  }
 0x20d   :  { %5529 = vmatpush3.bf16.msra.mxu1 %v6314_v38  ;;  %v6360_v38 = vld [vmem:[#allocation7 + $0x710] ss:$12 sps:$4 sm:$0xff]  }
 0x20e   :  { %5530 = vmatprep.subr.bf16.mxu1 %v6315_v39  ;;  %v6356_v39 = vld [vmem:[#allocation7 + $0x588] ss:$12 sps:$4 sm:$0xff]  }
 0x20f   :  { %4487 = vmatpush1.bf16.msra.mxu0 %v6311_v41  ;;  %v6363_v41 = vld [vmem:[#allocation7 + $0x5a4] ss:$12 sps:$4 sm:$0xff]  }
 0x210   :  { %4488 = vmatprep.subr.bf16.mxu0 %v6318_v44  ;;  %v6364_v44 = vld [vmem:[#allocation7 + $0x650] ss:$12 sps:$4 sm:$0xff]  }
 0x211   :  { %5531 = vmatpush3.bf16.msra.mxu1 %v6319_v18  ;;  %v6365_v18 = vld [vmem:[#allocation7 + $0x728] ss:$12 sps:$4 sm:$0xff]  }
 0x212   :  { %5532 = vmatprep.subr.bf16.mxu1 %v6320_v46  ;;  %v6361_v46 = vld [vmem:[#allocation7 + $0x5a0] ss:$12 sps:$4 sm:$0xff]  }
 0x213   :  { %4489 = vmatpush1.bf16.msra.mxu0 %v6316_v49  ;;  %v6368_v49 = vld [vmem:[#allocation7 + $0x5bc] ss:$12 sps:$4 sm:$0xff]  }
 0x214   :  { %4490 = vmatprep.subr.bf16.mxu0 %v6323_v52  ;;  %v6369_v52 = vld [vmem:[#allocation7 + $0x668] ss:$12 sps:$4 sm:$0xff]  }
 0x215   :  { %5533 = vmatpush3.bf16.msra.mxu1 %v6324_v48  ;;  %v6370_v48 = vld [vmem:[#allocation7 + $0x740] ss:$12 sps:$4 sm:$0xff]  }
 0x216   :  { %5534 = vmatprep.subr.bf16.mxu1 %v6325_v53  ;;  %v6366_v53 = vld [vmem:[#allocation7 + $0x5b8] ss:$12 sps:$4 sm:$0xff]  }
 0x217   :  { %4491 = vmatpush1.bf16.msra.mxu0 %v6321_v54  ;;  %v6373_v54 = vld [vmem:[#allocation7 + $0x5d4] ss:$12 sps:$4 sm:$0xff]  }
 0x218   :  { %4492 = vmatprep.subr.bf16.mxu0 %v6328_v55  ;;  %v6374_v55 = vld [vmem:[#allocation7 + $0x680] ss:$12 sps:$4 sm:$0xff]  }
 0x219   :  { %5535 = vmatpush3.bf16.msra.mxu1 %v6329_v58  ;;  %v6371_v58 = vld [vmem:[#allocation7 + $0x5d0] ss:$12 sps:$4 sm:$0xff]  }
 0x21a   :  { %5536 = vmatprep.subr.bf16.mxu1 %v6330_v60  ;;  %v6379_v60 = vld [vmem:[#allocation7 + $0x698] ss:$12 sps:$4 sm:$0xff]  }
 0x21b   :  { %4493 = vmatpush1.bf16.msra.mxu0 %v6326_v61  ;;  %v2199_v5 = vpop.f32.mrb[8].mxu1  ;;  %v6380_v61 = vld [vmem:[#allocation7 + $0x770] ss:$12 sps:$4 sm:$0xff]  }
 0x21c   :  { %v5604_v9 = vadd.f32 %v2199_v5, %v375_v0  ;;  %v2201_v10 = vpop.f32.mrb[9].mxu1  ;;  %4494 = vmatprep.subr.bf16.mxu0 %v6333_v1  ;;  %v6384_v1 = vld [vmem:[#allocation7 + $0x6b0] ss:$12 sps:$4 sm:$0xff]   ;;  %v6410_v5 = vld [vmem:[#allocation7 + $0x788] ss:$12 sps:$4 sm:$0xff]  }
 0x21d   :  { %v5605_v12 = vadd.f32 %v2201_v10, %v379_v2  ;;  %v2203_v13 = vpop.f32.mrb[10].mxu1  ;;  %5537 = vmatpush3.bf16.msra.mxu1 %v6334_v3  ;;  %v6381_v3 = vld [vmem:[#allocation7 + $0x600] ss:$12 sps:$4 sm:$0xff]  }
 0x21e   :  { %v2386_v4 = vmax.f32 %v5604_v9, 0.0  ;;  %v5606_v7 = vadd.f32 %v2203_v13, %v375_v0  ;;  %v2205_v15 = vpop.f32.mrb[11].mxu1  ;;  %5538 = vmatprep.subr.bf16.mxu1 %v6335_v43  ;;  %v6383_v0 = vld [vmem:[#allocation7 + $0x604] ss:$12 sps:$4 sm:$0xff]   ;;  %v6387_v43 = vld [vmem:[#allocation7 + $0x61c] ss:$12 sps:$4 sm:$0xff]  }
 0x21f   :  { %v5607_v63 = vadd.f32 %v2205_v15, %v379_v2  ;;  %4495 = vmatpush1.bf16.msra.mxu0 %v6331_v8  ;;  %v2387_v20 = vmax.f32 %v5605_v12, 0.0  ;;  %v6409_v2 = vld [vmem:[#allocation7 + $0x848] ss:$12 sps:$4 sm:$0xff]   ;;  %v6414_v8 = vld [vmem:[#allocation7 + $0x860] ss:$12 sps:$4 sm:$0xff]  }
 0x220   :  { %v2398_v19 = vmax.f32 %v5606_v7, 0.0  ;;  %4496 = vmatprep.subr.bf16.mxu0 %v6338_v11  ;;  %v6385_v9 = vld [vmem:[#allocation7 + $0x618] ss:$12 sps:$4 sm:$0xff]   ;;  %v6390_v10 = vld [vmem:[#allocation7 + $0x634] ss:$12 sps:$4 sm:$0xff]  }
 0x221   :  { %v2399_v21 = vmax.f32 %v5607_v63, 0.0  ;;  %5539 = vmatpush3.bf16.msra.mxu1 %v6339_v14  ;;  %v6415_v11 = vld [vmem:[#allocation7 + $0x7a0] ss:$12 sps:$4 sm:$0xff]   ;;  %v6419_v12 = vld [vmem:[#allocation7 + $0x878] ss:$12 sps:$4 sm:$0xff]  }
 0x222   :  { %v6761_v23 = vpack.c.bf16 %v2398_v19, %v2386_v4  ;;  %5540 = vmatprep.subr.bf16.mxu1 %v6340_v51  ;;  %v6388_v13 = vld [vmem:[#allocation7 + $0x630] ss:$12 sps:$4 sm:$0xff]   ;;  %v6393_v14 = vld [vmem:[#allocation7 + $0x64c] ss:$12 sps:$4 sm:$0xff]   ;;  %v6391_v15 = vld [vmem:[#allocation7 + $0x648] ss:$12 sps:$4 sm:$0xff]  }
 0x223   :  { %v2411_v25 = vpack.c.bf16 %v2399_v21, %v2387_v20  ;;  %4497 = vmatpush1.bf16.msra.mxu0 %v6336_v17  ;;  %v6420_v4 = vld [vmem:[#allocation7 + $0x7b8] ss:$12 sps:$4 sm:$0xff]   ;;  %v6424_v7 = vld [vmem:[#allocation7 + $0x890] ss:$12 sps:$4 sm:$0xff]   ;;  %v6429_v63 = vld [vmem:[#allocation7 + $0x8a8] ss:$12 sps:$4 sm:$0xff]  }
 0x224   :  { %4498 = vmatprep.subr.bf16.mxu0 %v6343_v57  ;;  %v6425_v51 = vld [vmem:[#allocation7 + $0x7d0] ss:$12 sps:$4 sm:$0xff]   ;;  %v6394_v17 = vld [vmem:[#allocation7 + $0x660] ss:$12 sps:$4 sm:$0xff]   ;;  %v6430_v57 = vld [vmem:[#allocation7 + $0x7e8] ss:$12 sps:$4 sm:$0xff]  }
 0x225   :  { %4514 = vmatprep.mubr.bf16.mxu0 %v2411_v25  ;;  %5541 = vmatpush3.bf16.msra.mxu1 %v6344_v22  ;;  %v6399_v19 = vld [vmem:[#allocation7 + $0x67c] ss:$12 sps:$4 sm:$0xff]   ;;  %v6434_v20 = vld [vmem:[#allocation7 + $0x8c0] ss:$12 sps:$4 sm:$0xff]   ;;  %v6397_v21 = vld [vmem:[#allocation7 + $0x678] ss:$12 sps:$4 sm:$0xff]  }
 0x226   :  { %4766 = vmatprep.mubr.bf16.mxu1 %v2411_v25  ;;  %5548 = vmatprep.subr.bf16.mxu1 %v6345_v24  ;;  %v6402_v22 = vld [vmem:[#allocation7 + $0x694] ss:$12 sps:$4 sm:$0xff]   ;;  %v6439_v24 = vld [vmem:[#allocation7 + $0x8d8] ss:$12 sps:$4 sm:$0xff]   ;;  %v6400_v25 = vld [vmem:[#allocation7 + $0x690] ss:$12 sps:$4 sm:$0xff]  }
 0x227   :  { %4499 = vmatpush1.bf16.msra.mxu0 %v6341_v26  ;;  %v6405_v26 = vld [vmem:[#allocation7 + $0x6ac] ss:$12 sps:$4 sm:$0xff]  }
 0x228   :  { %4767 = vmatmul.mubr.bf16.vlgmr.msra.gmra.mrb[28].mxu1 %v6761_v23  ;;  %4500 = vmatprep.subr.bf16.mxu0 %v6348_v27  ;;  %v6440_v27 = vld [vmem:[#allocation7 + $0x818] ss:$12 sps:$4 sm:$0xff]  }
 0x229   :  { %5549 = vmatpush3.bf16.msra.mxu1 %v6349_v29  ;;  %4807 = vmatprep.mubr.bf16.mxu1 %v6750_v50  ;;  %v6444_v29 = vld [vmem:[#allocation7 + $0x8f0] ss:$12 sps:$4 sm:$0xff]  }
 0x22a   :  { %5550 = vmatprep.subr.bf16.mxu1 %v6350_v30  ;;  %v6403_v30 = vld [vmem:[#allocation7 + $0x6a8] ss:$12 sps:$4 sm:$0xff]  }
 0x22b   :  { %4501 = vmatpush1.bf16.msra.mxu0 %v6346_v31  ;;  %v6408_v31 = vld [vmem:[#allocation7 + $0x6c4] ss:$12 sps:$4 sm:$0xff]  }
 0x22c   :  { %4502 = vmatprep.subr.bf16.mxu0 %v6353_v32  ;;  %v6445_v32 = vld [vmem:[#allocation7 + $0x830] ss:$12 sps:$4 sm:$0xff]  }
 0x22d   :  { %5551 = vmatpush3.bf16.msra.mxu1 %v6354_v33  ;;  %v6406_v33 = vld [vmem:[#allocation7 + $0x6c0] ss:$12 sps:$4 sm:$0xff]  }
 0x22e   :  { %5552 = vmatprep.subr.bf16.mxu1 %v6355_v35  ;;  %v6413_v35 = vld [vmem:[#allocation7 + $0x6dc] ss:$12 sps:$4 sm:$0xff]  }
 0x22f   :  { %4503 = vmatpush1.bf16.msra.mxu0 %v6351_v36  ;;  %v6411_v36 = vld [vmem:[#allocation7 + $0x6d8] ss:$12 sps:$4 sm:$0xff]  }
 0x230   :  { %4504 = vmatprep.subr.bf16.mxu0 %v6358_v37  ;;  %v6418_v37 = vld [vmem:[#allocation7 + $0x6f4] ss:$12 sps:$4 sm:$0xff]  }
 0x231   :  { %5553 = vmatpush3.bf16.msra.mxu1 %v6359_v28  ;;  %v6416_v28 = vld [vmem:[#allocation7 + $0x6f0] ss:$12 sps:$4 sm:$0xff]  }
 0x232   :  { %5554 = vmatprep.subr.bf16.mxu1 %v6360_v38  ;;  %v6423_v38 = vld [vmem:[#allocation7 + $0x70c] ss:$12 sps:$4 sm:$0xff]  }
 0x233   :  { %4505 = vmatpush1.bf16.msra.mxu0 %v6356_v39  ;;  %v6421_v39 = vld [vmem:[#allocation7 + $0x708] ss:$12 sps:$4 sm:$0xff]  }
 0x234   :  { %4506 = vmatprep.subr.bf16.mxu0 %v6363_v41  ;;  %v6428_v41 = vld [vmem:[#allocation7 + $0x724] ss:$12 sps:$4 sm:$0xff]  }
 0x235   :  { %5555 = vmatpush3.bf16.msra.mxu1 %v6364_v44  ;;  %v6426_v44 = vld [vmem:[#allocation7 + $0x720] ss:$12 sps:$4 sm:$0xff]  }
 0x236   :  { %5556 = vmatprep.subr.bf16.mxu1 %v6365_v18  ;;  %v6433_v18 = vld [vmem:[#allocation7 + $0x73c] ss:$12 sps:$4 sm:$0xff]  }
 0x237   :  { %4507 = vmatpush1.bf16.msra.mxu0 %v6361_v46  ;;  %v6431_v46 = vld [vmem:[#allocation7 + $0x738] ss:$12 sps:$4 sm:$0xff]  }
 0x238   :  { %4508 = vmatprep.subr.bf16.mxu0 %v6368_v49  ;;  %v391_v49 = vrot.slane %v6742_v16, %v6726_v42 }
 0x239   :  { %5557 = vmatpush3.bf16.msra.mxu1 %v6369_v52  ;;  %v6438_v52 = vld [vmem:[#allocation7 + $0x754] ss:$12 sps:$4 sm:$0xff]  }
 0x23a   :  { %5558 = vmatprep.subr.bf16.mxu1 %v6370_v48  ;;  %v395_v48 = vrot.slane %v6742_v16, %v362_v34 }
 0x23b   :  { %4509 = vmatpush1.bf16.msra.mxu0 %v6366_v53 }
 0x23c   :  { %4510 = vmatprep.subr.bf16.mxu0 %v6373_v54  ;;  %v6436_v54 = vld [vmem:[#allocation7 + $0x750] ss:$12 sps:$4 sm:$0xff]  }
 0x23d   :  { %5559 = vmatpush3.bf16.msra.mxu1 %v6374_v55 }
 0x23e   :  { %5560 = vmatprep.subr.bf16.mxu1 %v6375_v56 }
 0x23f   :  { %4511 = vmatpush1.bf16.msra.mxu0 %v6371_v58  ;;  %v6443_v58 = vld [vmem:[#allocation7 + $0x76c] ss:$12 sps:$4 sm:$0xff]  }
 0x240   :  { %4512 = vmatprep.subr.bf16.mxu0 %v6378_v59 }
 0x241   :  { %5561 = vmatpush3.bf16.msra.mxu1 %v6379_v60 }
 0x242   :  { %5562 = vmatprep.subr.bf16.mxu1 %v6380_v61 }
 0x243   :  { %4513 = vmatpush1.bf16.msra.mxu0 %v6376_v62 }
 0x244   :  { %4525 = vmatprep.subr.bf16.mxu0 %v6383_v0 }
 0x245   :  { %5563 = vmatpush3.bf16.msra.mxu1 %v6384_v1 }
 0x246   :  { %4515 = vmatmul.mubr.bf16.vlgmr.msra.gmra.mrb[8].mxu0 %v6761_v23  ;;  %5570 = vmatprep.subr.bf16.mxu1 %v6409_v2  ;;  %v6435_v23 = vld [vmem:[#allocation7 + $0x800] ss:$12 sps:$4 sm:$0xff]  }
 0x247   :  { %4526 = vmatpush1.bf16.msra.mxu0 %v6381_v3  ;;  %4557 = vmatprep.mubr.bf16.mxu0 %v6750_v50  ;;  %v6396_v50 = vld [vmem:[#allocation7 + $0x664] ss:$12 sps:$4 sm:$0xff]   ;;  %v6441_v3 = vld [vmem:[#allocation7 + $0x768] ss:$12 sps:$4 sm:$0xff]  }
 0x248   :  { %4808 = vmatmul.mubr.bf16.vlgmr.msra.gmra.mrb[32].mxu1 %v6748_v47  ;;  %4527 = vmatprep.subr.bf16.mxu0 %v6387_v43 }
 0x249   :  { %5571 = vmatpush3.bf16.msra.mxu1 %v6410_v5 }
 0x24a   :  { %5572 = vmatprep.subr.bf16.mxu1 %v6414_v8  ;;  %v6446_v8 = vld [vmem:[#allocation7 + $0x780] ss:$12 sps:$4 sm:$0xff]  }
 0x24b   :  { %4528 = vmatpush1.bf16.msra.mxu0 %v6385_v9  ;;  %v6451_v9 = vld [vmem:[#allocation7 + $0x79c] ss:$12 sps:$4 sm:$0xff]  }
 0x24c   :  { %4529 = vmatprep.subr.bf16.mxu0 %v6390_v10  ;;  %v6449_v10 = vld [vmem:[#allocation7 + $0x798] ss:$12 sps:$4 sm:$0xff]  }
 0x24d   :  { %5573 = vmatpush3.bf16.msra.mxu1 %v6415_v11  ;;  %v6454_v11 = vld [vmem:[#allocation7 + $0x7b4] ss:$12 sps:$4 sm:$0xff]  }
 0x24e   :  { %5574 = vmatprep.subr.bf16.mxu1 %v6419_v12  ;;  %v6452_v12 = vld [vmem:[#allocation7 + $0x7b0] ss:$12 sps:$4 sm:$0xff]  }
 0x24f   :  { %4530 = vmatpush1.bf16.msra.mxu0 %v6388_v13  ;;  %v6457_v13 = vld [vmem:[#allocation7 + $0x7cc] ss:$12 sps:$4 sm:$0xff]  }
 0x250   :  { %4531 = vmatprep.subr.bf16.mxu0 %v6393_v14  ;;  %v6455_v14 = vld [vmem:[#allocation7 + $0x7c8] ss:$12 sps:$4 sm:$0xff]  }
 0x251   :  { %5575 = vmatpush3.bf16.msra.mxu1 %v6420_v4  ;;  %v6460_v4 = vld [vmem:[#allocation7 + $0x7e4] ss:$12 sps:$4 sm:$0xff]  }
 0x252   :  { %5576 = vmatprep.subr.bf16.mxu1 %v6424_v7  ;;  %v6458_v7 = vld [vmem:[#allocation7 + $0x7e0] ss:$12 sps:$4 sm:$0xff]  }
 0x253   :  { %4532 = vmatpush1.bf16.msra.mxu0 %v6391_v15  ;;  %v6463_v15 = vld [vmem:[#allocation7 + $0x7fc] ss:$12 sps:$4 sm:$0xff]  }
 0x254   :  { %4533 = vmatprep.subr.bf16.mxu0 %v6396_v50  ;;  %v6466_v50 = vld [vmem:[#allocation7 + $0x814] ss:$12 sps:$4 sm:$0xff]  }
 0x255   :  { %5577 = vmatpush3.bf16.msra.mxu1 %v6425_v51 }
 0x256   :  { %5578 = vmatprep.subr.bf16.mxu1 %v6429_v63  ;;  %v6464_v63 = vld [vmem:[#allocation7 + $0x810] ss:$12 sps:$4 sm:$0xff]  }
 0x257   :  { %4534 = vmatpush1.bf16.msra.mxu0 %v6394_v17 }
 0x258   :  { %4535 = vmatprep.subr.bf16.mxu0 %v6399_v19  ;;  %v6469_v19 = vld [vmem:[#allocation7 + $0x82c] ss:$12 sps:$4 sm:$0xff]  }
 0x259   :  { %5579 = vmatpush3.bf16.msra.mxu1 %v6430_v57 }
 0x25a   :  { %5580 = vmatprep.subr.bf16.mxu1 %v6434_v20 }
 0x25b   :  { %4536 = vmatpush1.bf16.msra.mxu0 %v6397_v21 }
 0x25c   :  { %4537 = vmatprep.subr.bf16.mxu0 %v6402_v22 }
 0x25d   :  { %5581 = vmatpush3.bf16.msra.mxu1 %v6435_v23  ;;  %v6467_v23 = vld [vmem:[#allocation7 + $0x828] ss:$12 sps:$4 sm:$0xff]  }
 0x25e   :  { %5582 = vmatprep.subr.bf16.mxu1 %v6439_v24  ;;  %v6472_v24 = vld [vmem:[#allocation7 + $0x844] ss:$12 sps:$4 sm:$0xff]  }
 0x25f   :  { %4538 = vmatpush1.bf16.msra.mxu0 %v6400_v25  ;;  %v6470_v25 = vld [vmem:[#allocation7 + $0x840] ss:$12 sps:$4 sm:$0xff]  }
 0x260   :  { %4539 = vmatprep.subr.bf16.mxu0 %v6405_v26  ;;  %v6475_v26 = vld [vmem:[#allocation7 + $0x85c] ss:$12 sps:$4 sm:$0xff]  }
 0x261   :  { %5583 = vmatpush3.bf16.msra.mxu1 %v6440_v27  ;;  %v6473_v27 = vld [vmem:[#allocation7 + $0x858] ss:$12 sps:$4 sm:$0xff]  }
 0x262   :  { %5584 = vmatprep.subr.bf16.mxu1 %v6444_v29  ;;  %v6478_v29 = vld [vmem:[#allocation7 + $0x874] ss:$12 sps:$4 sm:$0xff]  }
 0x263   :  { %4540 = vmatpush1.bf16.msra.mxu0 %v6403_v30  ;;  %v6476_v30 = vld [vmem:[#allocation7 + $0x870] ss:$12 sps:$4 sm:$0xff]  }
 0x264   :  { %4541 = vmatprep.subr.bf16.mxu0 %v6408_v31  ;;  %v6481_v31 = vld [vmem:[#allocation7 + $0x88c] ss:$12 sps:$4 sm:$0xff]  }
 0x265   :  { %5585 = vmatpush3.bf16.msra.mxu1 %v6445_v32  ;;  %v6479_v32 = vld [vmem:[#allocation7 + $0x888] ss:$12 sps:$4 sm:$0xff]  }
 0x267   :  { %4542 = vmatpush1.bf16.msra.mxu0 %v6406_v33  ;;  %v6484_v33 = vld [vmem:[#allocation7 + $0x8a4] ss:$12 sps:$4 sm:$0xff]  }
 0x268   :  { %4543 = vmatprep.subr.bf16.mxu0 %v6413_v35  ;;  %v6482_v35 = vld [vmem:[#allocation7 + $0x8a0] ss:$12 sps:$4 sm:$0xff]  }
 0x26b   :  { %4544 = vmatpush1.bf16.msra.mxu0 %v6411_v36  ;;  %v6487_v36 = vld [vmem:[#allocation7 + $0x8bc] ss:$12 sps:$4 sm:$0xff]  }
 0x26c   :  { %4545 = vmatprep.subr.bf16.mxu0 %v6418_v37  ;;  %v2800_v37 = vld [vmem:[%s6801_s5] sm:$0x7]  ;;  %s6577_s5 = smov [#allocation9]  }
 0x26d   :  { %s4868_s15 = sshll.u32 %s6577_s5, 4  ;;  %s4869_s15 = int_to_ptr.vmem [resolvable:$true] %s4868_s15 }
 0x26e   :  { %s6542_s16 = scalar_lea.vmem %s4869_s15, 768  ;;  %p6547_p3 = scmp.lt.s32.totalorder %s4869_s15, %s4869_s15 }
 0x26f   :  { %4546 = vmatpush1.bf16.msra.mxu0 %v6416_v28  ;;  %v6485_v28 = vld [vmem:[#allocation7 + $0x8b8] ss:$12 sps:$4 sm:$0xff]   ;;  %p6543_p2 = scmp.ne.s32.totalorder %s4869_s15, %s6542_s16  ;;  %p6548_p4 = scmp.lt.s32.totalorder %s6542_s16, %s6542_s16 }
 0x270   :  { %4547 = vmatprep.subr.bf16.mxu0 %v6423_v38  ;;  %v6490_v38 = vld [vmem:[#allocation7 + $0x8d4] ss:$12 sps:$4 sm:$0xff]  }
 0x271   :  { %p6549_p5 = por %p6548_p4, %p6547_p3 }
 0x273   :  { %4548 = vmatpush1.bf16.msra.mxu0 %v6421_v39  ;;  %v2813_v39 = vrot.slane %v2800_v37, %v6726_v42  ;;  %p6550_p6 = pnand %p6549_p5, %p6543_p2 }
 0x274   :  { %4549 = vmatprep.subr.bf16.mxu0 %v6428_v41 }
 0x277   :  { %4550 = vmatpush1.bf16.msra.mxu0 %v6426_v44  ;;  %v6488_v44 = vld [vmem:[#allocation7 + $0x8d0] ss:$12 sps:$4 sm:$0xff]  }
 0x278   :  { %4551 = vmatprep.subr.bf16.mxu0 %v6433_v18 }
 0x27b   :  { %4552 = vmatpush1.bf16.msra.mxu0 %v6431_v46  ;;  %v2371_v53 = vpop.f32.mrb[12].mxu1  ;;  %v6493_v46 = vld [vmem:[#allocation7 + $0x8ec] ss:$12 sps:$4 sm:$0xff]  }
 0x27c   :  { %v5612_v55 = vadd.f32 %v2371_v53, %v391_v49  ;;  %v2373_v56 = vpop.f32.mrb[13].mxu1  ;;  %4553 = vmatprep.subr.bf16.mxu0 %v6438_v52 }
 0x27d   :  { %v5613_v59 = vadd.f32 %v2373_v56, %v395_v48  ;;  %v2375_v60 = vpop.f32.mrb[14].mxu1 }
 0x27e   :  { %v2390_v61 = vmax.f32 %v5612_v55, 0.0  ;;  %v5614_v62 = vadd.f32 %v2375_v60, %v391_v49  ;;  %v2377_v0 = vpop.f32.mrb[15].mxu1 }
 0x27f   :  { %v2391_v1 = vmax.f32 %v5613_v59, 0.0  ;;  %v5615_v2 = vadd.f32 %v2377_v0, %v395_v48  ;;  %4554 = vmatpush1.bf16.msra.mxu0 %v6436_v54 }
 0x280   :  { %v2402_v43 = vmax.f32 %v5614_v62, 0.0  ;;  %4555 = vmatprep.subr.bf16.mxu0 %v6443_v58  ;;  %v6491_v58 = vld [vmem:[#allocation7 + $0x8e8] ss:$12 sps:$4 sm:$0xff]  }
 0x281   :  { %v2403_v34 = vmax.f32 %v5615_v2, 0.0 }
 0x282   :  { %v6773_v16 = vpack.c.bf16 %v2402_v43, %v2390_v61 }
 0x283   :  { %v2415_v5 = vpack.c.bf16 %v2403_v34, %v2391_v1  ;;  %4556 = vmatpush1.bf16.msra.mxu0 %v6441_v3 }
 0x284   :  { %4568 = vmatprep.subr.bf16.mxu0 %v6448_v40 }
 0x285   :  { %4848 = vmatprep.mubr.bf16.mxu1 %v2415_v5 }
 0x286   :  { %4558 = vmatmul.mubr.bf16.vlgmr.msra.gmra.mrb[8].mxu0 %v6748_v47  ;;  %4849 = vmatmul.mubr.bf16.vlgmr.msra.gmra.mrb[36].mxu1 %v6773_v16  ;;  %v6461_v47 = vld [vmem:[#allocation7 + $0x7f8] ss:$12 sps:$4 sm:$0xff]  }
 0x287   :  { %4569 = vmatpush1.bf16.msra.mxu0 %v6446_v8  ;;  %4600 = vmatprep.mubr.bf16.mxu0 %v2415_v5 }
 0x288   :  { %4570 = vmatprep.subr.bf16.mxu0 %v6451_v9 }
 0x28b   :  { %4571 = vmatpush1.bf16.msra.mxu0 %v6449_v10 }
 0x28c   :  { %4572 = vmatprep.subr.bf16.mxu0 %v6454_v11 }
 0x28f   :  { %4573 = vmatpush1.bf16.msra.mxu0 %v6452_v12 }
 0x290   :  { %4574 = vmatprep.subr.bf16.mxu0 %v6457_v13 }
 0x293   :  { %4575 = vmatpush1.bf16.msra.mxu0 %v6455_v14 }
 0x294   :  { %4576 = vmatprep.subr.bf16.mxu0 %v6460_v4 }
 0x297   :  { %4577 = vmatpush1.bf16.msra.mxu0 %v6458_v7 }
 0x298   :  { %4578 = vmatprep.subr.bf16.mxu0 %v6463_v15 }
 0x29b   :  { %4579 = vmatpush1.bf16.msra.mxu0 %v6461_v47  ;;  %v5476_v51 = vpop.f32.mrb[16].mxu1 }
 0x29c   :  { %v5477_v17 = vpop.f32.mrb[17].mxu1  ;;  %4580 = vmatprep.subr.bf16.mxu0 %v6466_v50 }
 0x29d   :  { %v5478_v57 = vadd.f32 %v5477_v17, %v5476_v51  ;;  %v5479_v20 = vpop.f32.mrb[18].mxu1 }
 0x29e   :  { %v5480_v21 = vpop.f32.mrb[19].mxu1 }
 0x29f   :  { %4581 = vmatpush1.bf16.msra.mxu0 %v6464_v63  ;;  %v5481_v22 = vadd.f32 %v5480_v21, %v5479_v20  ;;  %v4646_v49 = vadd.f32 %v5478_v57, %v2813_v39 }
 0x2a0   :  { %4582 = vmatprep.subr.bf16.mxu0 %v6469_v19 }
 0x2a1   :  { %v4649_v54 = vadd.f32 %v5481_v22, %v2813_v39  ;;  %v2805_v22 = vrot.slane %v2800_v37, %v6698_v6 }
 0x2a3   :  { %4583 = vmatpush1.bf16.msra.mxu0 %v6467_v23  ;;  %v2809_v23 = vrot.slane %v2800_v37, %v6701_v45 }
 0x2a4   :  { %4584 = vmatprep.subr.bf16.mxu0 %v6472_v24 }
 0x2a7   :  { %4585 = vmatpush1.bf16.msra.mxu0 %v6470_v25 }
 0x2a8   :  { %4586 = vmatprep.subr.bf16.mxu0 %v6475_v26 }
 0x2ab   :  { %4587 = vmatpush1.bf16.msra.mxu0 %v6473_v27 }
 0x2ac   :  { %4588 = vmatprep.subr.bf16.mxu0 %v6478_v29 }
 0x2af   :  { %4589 = vmatpush1.bf16.msra.mxu0 %v6476_v30 }
 0x2b0   :  { %4590 = vmatprep.subr.bf16.mxu0 %v6481_v31 }
 0x2b3   :  { %4591 = vmatpush1.bf16.msra.mxu0 %v6479_v32 }
 0x2b4   :  { %4592 = vmatprep.subr.bf16.mxu0 %v6484_v33 }
 0x2b7   :  { %4593 = vmatpush1.bf16.msra.mxu0 %v6482_v35 }
 0x2b8   :  { %4594 = vmatprep.subr.bf16.mxu0 %v6487_v36 }
 0x2bb   :  { %4595 = vmatpush1.bf16.msra.mxu0 %v6485_v28  ;;  %v5498_v41 = vpop.f32.mrb[20].mxu1 }
 0x2bc   :  { %v5499_v18 = vpop.f32.mrb[21].mxu1  ;;  %4596 = vmatprep.subr.bf16.mxu0 %v6490_v38 }
 0x2bd   :  { %v5500_v52 = vadd.f32 %v5499_v18, %v5498_v41  ;;  %v5501_v48 = vpop.f32.mrb[22].mxu1 }
 0x2be   :  { %v5502_v53 = vpop.f32.mrb[23].mxu1 }
 0x2bf   :  { %v4687_v55 = vadd.f32 %v5500_v52, %v4646_v49  ;;  %4597 = vmatpush1.bf16.msra.mxu0 %v6488_v44  ;;  %v5503_v56 = vadd.f32 %v5502_v53, %v5501_v48 }
 0x2c0   :  { %4598 = vmatprep.subr.bf16.mxu0 %v6493_v46 }
 0x2c1   :  { %v4690_v59 = vadd.f32 %v5503_v56, %v4649_v54 }
 0x2c3   :  { %4599 = vmatpush1.bf16.msra.mxu0 %v6491_v58 }
 0x2c6   :  { %4601 = vmatmul.mubr.bf16.vlgmr.msra.gmra.mrb[8].mxu0 %v6773_v16 }
 0x2db   :  { %v5520_v42 = vpop.f32.mrb[24].mxu1 }
 0x2dc   :  { %v5521_v60 = vpop.f32.mrb[25].mxu1 }
 0x2dd   :  { %v5522_v61 = vadd.f32 %v5521_v60, %v5520_v42  ;;  %v5523_v62 = vpop.f32.mrb[26].mxu1 }
 0x2de   :  { %v5524_v0 = vpop.f32.mrb[27].mxu1 }
 0x2df   :  { %v4728_v1 = vadd.f32 %v5522_v61, %v4687_v55  ;;  %v5525_v2 = vadd.f32 %v5524_v0, %v5523_v62 }
 0x2e1   :  { %v4731_v3 = vadd.f32 %v5525_v2, %v4690_v59 }
 0x2fb   :  { %v5542_v43 = vpop.f32.mrb[28].mxu1 }
 0x2fc   :  { %v5543_v40 = vpop.f32.mrb[29].mxu1 }
 0x2fd   :  { %v5544_v34 = vadd.f32 %v5543_v40, %v5542_v43  ;;  %v5545_v5 = vpop.f32.mrb[30].mxu1 }
 0x2fe   :  { %v5546_v8 = vpop.f32.mrb[31].mxu1 }
 0x2ff   :  { %v4769_v9 = vadd.f32 %v5544_v34, %v4728_v1  ;;  %v5547_v10 = vadd.f32 %v5546_v8, %v5545_v5 }
 0x301   :  { %v4772_v11 = vadd.f32 %v5547_v10, %v4731_v3 }
 0x31b   :  { %v5564_v12 = vpop.f32.mrb[32].mxu1 }
 0x31c   :  { %v5565_v13 = vpop.f32.mrb[33].mxu1 }
 0x31d   :  { %v5566_v14 = vadd.f32 %v5565_v13, %v5564_v12  ;;  %v5567_v16 = vpop.f32.mrb[34].mxu1 }
 0x31e   :  { %v5568_v4 = vpop.f32.mrb[35].mxu1 }
 0x31f   :  { %v4810_v7 = vadd.f32 %v5566_v14, %v4769_v9  ;;  %v5569_v15 = vadd.f32 %v5568_v4, %v5567_v16 }
 0x321   :  { %v4813_v47 = vadd.f32 %v5569_v15, %v4772_v11 }
 0x359   :  { %v5586_v50 = vpop.f32.mrb[36].mxu1 }
 0x35a   :  { %v5587_v51 = vpop.f32.mrb[37].mxu1 }
 0x35b   :  { %v5588_v63 = vadd.f32 %v5587_v51, %v5586_v50  ;;  %v5589_v17 = vpop.f32.mrb[38].mxu1 }
 0x35c   :  { %v5590_v19 = vpop.f32.mrb[39].mxu1 }
 0x35d   :  { %v4851_v57 = vadd.f32 %v5588_v63, %v4810_v7  ;;  %v5591_v20 = vadd.f32 %v5590_v19, %v5589_v17 }
 0x35f   :  { %4859 = vst [vmem:[#allocation9 + $0x10] sm:$0xff] %v4851_v57  ;;  %v4854_v21 = vadd.f32 %v5591_v20, %v4813_v47 }
 0x361   :  { %4862 = vst [vmem:[#allocation9 + $0x28] sm:$0xff] %v4854_v21 }
 0x399   :  { %v4602_v24 = vpop.f32.mrb[8].mxu0 }
 0x39a   :  { %v5616_v25 = vadd.f32 %v4602_v24, %v2805_v22  ;;  %v4604_v26 = vpop.f32.mrb[9].mxu0 }
 0x39b   :  { %v5617_v27 = vadd.f32 %v4604_v26, %v2809_v23  ;;  %v4606_v29 = vpop.f32.mrb[10].mxu0 }
 0x39c   :  { %4857 = vst [vmem:[#allocation9] sm:$0xff] %v5616_v25  ;;  %v5618_v30 = vadd.f32 %v4606_v29, %v2805_v22  ;;  %v4608_v31 = vpop.f32.mrb[11].mxu0 }
 0x39d   :  { %4858 = vst [vmem:[#allocation9 + $0x8] sm:$0xff] %v5617_v27  ;;  %v5619_v32 = vadd.f32 %v4608_v31, %v2809_v23 }
 0x39e   :  { %4860 = vst [vmem:[#allocation9 + $0x18] sm:$0xff] %v5618_v30 }
 0x39f   :  { %4861 = vst [vmem:[#allocation9 + $0x20] sm:$0xff] %v5619_v32 }
 0x3a0   :  { %6553 = shalt.err (!%p6550_p6)
}
 0x3a1   :  { %s6554_s19 = scalar_lea.hbm %s6802_s6, 768 }
 0x3a2   :  { %p6555_p7 = scmp.ne.s32.totalorder %s6802_s6, %s6554_s19  ;;  %p6558_p8 = scmp.lt.u32.totalorder %s6554_s19, %s6802_s6 }
 0x3a4   :  { %p6560_p9 = pnand %p6558_p8, %p6555_p7 }
 0x3a6   :  { %6563 = shalt.err (!%p6560_p9)
}
 0x3a7   :  { %s6578_s4 = smov 384   ;;  %s6579_s22 = smov 24  }
 0x3a8   :  { %4874 = dma.vmem_to_hbm [thread:$0]  %s4869_s15, 768, %s6802_s6, [#allocation6], %s6578_s4, %s6578_s4, %s6579_s22  }
 0x3a9   :  { %6568 = dma.done.wait [#allocation6], 768  }
 0x3aa   :  { %6569 = vsyncadd [#allocation6], 4294966528 }
 0x3ab   :  { %4878 = vsyncpa [#allocation5], 1 }
 0x3ac   :  { %4879 = vsyncpa [#allocation8], 1 }
 0x3ad   :  { %4880 = vsyncpa [#allocation6], 1 }

</bundles_post_ra>
